<compile_context>
chip_gen: v7x
topology: tpu7x:2x2x1
jax: 0.10.0
libtpu: 0.0.40
codegen_flags: <defaults>
</compile_context>

<pallas_src>
import functools

import jax
import jax.numpy as jnp
from jax.experimental import pallas as pl
from jax.experimental.pallas import tpu as pltpu

DROP_P = 0.5
BN_EPS = 1e-5

IN_F = 1000      # logical input features
IN_PAD = 1024    # padded to a multiple of 128
H0 = 512
H1 = 256
OUT_PAD = 128    # no_domain padded to a full lane width

# odd 32-bit mixing constants (expressed as signed int32 Python ints)
_C1 = -1640531527   # 0x9E3779B9
_C2 = -2048144777   # 0x85EBCA77
_SALT0 = 0x12345671
_SALT1 = 0x0ABCDEF5
_SALT2 = 0x07F4A7C3


def _keep_mask(shape, lg_cols, seed, salt):
    """Deterministic per-element keep mask with P(keep) = 0.5.

    Pure add/xor/shift-left integer hash of (row, col, seed, salt); the shift
    amounts {16,8,4,2,1} let every input bit reach the sign bit, which is the
    bit we test (full-word sign test, not the raw LSB).
    """
    r = jax.lax.broadcasted_iota(jnp.int32, shape, 0)
    c = jax.lax.broadcasted_iota(jnp.int32, shape, 1)
    h = (r << lg_cols) | c
    h = (h ^ seed) + salt
    h = h + _C1
    h = h ^ (h << 16)
    h = h + _C2
    h = h ^ (h << 8)
    h = h + _C1
    h = h ^ (h << 4)
    h = h + _C2
    h = h ^ (h << 2)
    h = h + _C1
    h = h ^ (h << 1)
    return h >= 0


def _dropout(v, keep):
    scale = 1.0 / (1.0 - DROP_P)
    return jnp.where(keep, v * scale, 0.0)


def _bn_relu(z, gamma, beta):
    mu = jnp.mean(z, axis=0, keepdims=True)
    var = jnp.mean((z - mu) ** 2, axis=0, keepdims=True)   # biased var (training BN)
    s = gamma * jax.lax.rsqrt(var + BN_EPS)                 # folded scale
    return jnp.maximum(z * s + (beta - mu * s), 0.0)        # folded shift + ReLU


def regressor_kernel(seed_ref,
                     x_ref, w0_ref, b0_ref,
                     w1_ref, b1_ref, g1_ref, bt1_ref,
                     w2_ref, b2_ref, g2_ref, bt2_ref,
                     out_ref):
    seed = seed_ref[0]

    # ---- x = relu(lin0(dropout(x))) ----
    x = x_ref[...]
    d0 = _dropout(x, _keep_mask(x.shape, 10, seed, _SALT0))          # (B, 1024)
    h0 = jnp.dot(d0.astype(jnp.bfloat16), w0_ref[...],
                 preferred_element_type=jnp.float32) + b0_ref[...]
    h0 = jnp.maximum(h0, 0.0)                                        # (B, 512)

    # ---- x = relu(bn1(lin1(dropout(x)))) ----
    d1 = _dropout(h0, _keep_mask(h0.shape, 9, seed, _SALT1))
    z1 = jnp.dot(d1.astype(jnp.bfloat16), w1_ref[...],
                 preferred_element_type=jnp.float32) + b1_ref[...]   # (B, 256)
    h1 = _bn_relu(z1, g1_ref[...], bt1_ref[...])

    # ---- latent = relu(bn2(lin2(dropout(x)))) ----
    d2 = _dropout(h1, _keep_mask(h1.shape, 8, seed, _SALT2))
    z2 = jnp.dot(d2.astype(jnp.bfloat16), w2_ref[...],
                 preferred_element_type=jnp.float32) + b2_ref[...]   # (B, 128)
    out_ref[...] = _bn_relu(z2, g2_ref[...], bt2_ref[...])


@functools.partial(jax.jit, static_argnames=("no_domain",))
def regressor_r18(x, params, seed, *, no_domain):
    B = x.shape[0]
    xp = jnp.pad(x, ((0, 0), (0, IN_PAD - x.shape[1])))   # zero-pad K to 1024

    vmem = pl.BlockSpec(memory_space=pltpu.VMEM)
    smem = pl.BlockSpec(memory_space=pltpu.SMEM)
    n_tensor_inputs = 11  # x + 3*(W,b) + 2*(gamma,beta)

    out = pl.pallas_call(
        regressor_kernel,
        out_shape=jax.ShapeDtypeStruct((B, OUT_PAD), jnp.float32),
        in_specs=[smem] + [vmem] * n_tensor_inputs,
        out_specs=vmem,
    )(
        seed,
        xp,
        params["w0"], params["b0"],
        params["w1"], params["b1"], params["g1"], params["bt1"],
        params["w2"], params["b2"], params["g2"], params["bt2"],
    )
    return out[:, :no_domain]


def init_params(key, no_domain):
    """Deterministic synthetic parameters matching Regressor_R18's shapes.

    Weights are stored pre-transposed (in_features, out_features), padded to
    lane-aligned shapes, and downcast to bfloat16 (matmul operands); biases and
    BN affine params stay f32.
    """
    k0, k1, k2, kb0, kb1, kb2 = jax.random.split(key, 6)

    w0 = jax.random.normal(k0, (IN_F, H0), jnp.float32) * 0.02
    w0 = jnp.pad(w0, ((0, IN_PAD - IN_F), (0, 0))).astype(jnp.bfloat16)   # (1024, 512)

    w1 = (jax.random.normal(k1, (H0, H1), jnp.float32) * 0.02).astype(jnp.bfloat16)

    w2 = jax.random.normal(k2, (H1, no_domain), jnp.float32) * 0.02
    w2 = jnp.pad(w2, ((0, 0), (0, OUT_PAD - no_domain))).astype(jnp.bfloat16)  # (256, 128)

    b0 = jax.random.normal(kb0, (1, H0), jnp.float32) * 0.01
    b1 = jax.random.normal(kb1, (1, H1), jnp.float32) * 0.01
    b2 = jnp.pad(jax.random.normal(kb2, (1, no_domain), jnp.float32) * 0.01,
                 ((0, 0), (0, OUT_PAD - no_domain)))

    g2 = jnp.pad(jnp.ones((1, no_domain), jnp.float32),
                 ((0, 0), (0, OUT_PAD - no_domain)), constant_values=1.0)
    bt2 = jnp.zeros((1, OUT_PAD), jnp.float32)

    return {
        "w0": w0, "b0": b0,
        "w1": w1, "b1": b1,
        "g1": jnp.ones((1, H1), jnp.float32), "bt1": jnp.zeros((1, H1), jnp.float32),
        "w2": w2, "b2": b2,
        "g2": g2, "bt2": bt2,
    }


if __name__ == "__main__":
    no_domain = 8
    batch = 8  # BatchNorm (training mode) needs batch > 1; 8 = one sublane tile

    key = jax.random.PRNGKey(0)
    kx, kp = jax.random.split(key)
    x = jax.random.normal(kx, (batch, IN_F), jnp.float32)
    params = init_params(kp, no_domain)
    seed = jnp.array([0], dtype=jnp.int32)

    out = regressor_r18(x, params, seed, no_domain=no_domain)
    out = jax.block_until_ready(out)

    assert out.shape == (batch, no_domain), out.shape
    assert out.dtype == jnp.float32
    assert bool(jnp.all(out >= 0.0))          # final ReLU
    assert bool(jnp.all(jnp.isfinite(out)))

    print("KERNEL_OK")
</pallas_src>

<mosaic_0001>
module attributes {stable_mosaic.version = 11 : i64} {
  func.func @regressor_kernel(%arg0: memref<1xi32, #tpu.memory_space<smem>>, %arg1: memref<8x1024xf32, #tpu.memory_space<vmem>>, %arg2: memref<1024x512xbf16, #tpu.memory_space<vmem>>, %arg3: memref<1x512xf32, #tpu.memory_space<vmem>>, %arg4: memref<512x256xbf16, #tpu.memory_space<vmem>>, %arg5: memref<1x256xf32, #tpu.memory_space<vmem>>, %arg6: memref<1x256xf32, #tpu.memory_space<vmem>>, %arg7: memref<1x256xf32, #tpu.memory_space<vmem>>, %arg8: memref<256x128xbf16, #tpu.memory_space<vmem>>, %arg9: memref<1x128xf32, #tpu.memory_space<vmem>>, %arg10: memref<1x128xf32, #tpu.memory_space<vmem>>, %arg11: memref<1x128xf32, #tpu.memory_space<vmem>>, %arg12: memref<8x128xf32, #tpu.memory_space<vmem>>) attributes {dimension_semantics = [], scalar_prefetch = 0 : i64, scratch_operands = 0 : i64, tpu.core_type = #tpu.core_type<tc>} {
    %c0 = arith.constant 0 : index
    %0 = memref.load %arg0[%c0] : memref<1xi32, #tpu.memory_space<smem>>
    %c0_0 = arith.constant 0 : index
    %c0_1 = arith.constant 0 : index
    %1 = vector.load %arg1[%c0_0, %c0_1] : memref<8x1024xf32, #tpu.memory_space<vmem>>, vector<8x1024xf32>
    %2 = tpu.iota {dimensions = array<i32: 0>} : vector<8x1024xi32>
    %3 = tpu.iota {dimensions = array<i32: 1>} : vector<8x1024xi32>
    %c10_i32 = arith.constant 10 : i32
    %4 = vector.broadcast %c10_i32 : i32 to vector<8x1024xi32>
    %5 = arith.shli %2, %4 : vector<8x1024xi32>
    %6 = arith.ori %5, %3 : vector<8x1024xi32>
    %7 = vector.broadcast %0 : i32 to vector<8x1024xi32>
    %8 = arith.xori %6, %7 : vector<8x1024xi32>
    %c305419889_i32 = arith.constant 305419889 : i32
    %9 = vector.broadcast %c305419889_i32 : i32 to vector<8x1024xi32>
    %10 = arith.addi %8, %9 : vector<8x1024xi32>
    %c-1640531527_i32 = arith.constant -1640531527 : i32
    %11 = vector.broadcast %c-1640531527_i32 : i32 to vector<8x1024xi32>
    %12 = arith.addi %10, %11 : vector<8x1024xi32>
    %c16_i32 = arith.constant 16 : i32
    %13 = vector.broadcast %c16_i32 : i32 to vector<8x1024xi32>
    %14 = arith.shli %12, %13 : vector<8x1024xi32>
    %15 = arith.xori %12, %14 : vector<8x1024xi32>
    %c-2048144777_i32 = arith.constant -2048144777 : i32
    %16 = vector.broadcast %c-2048144777_i32 : i32 to vector<8x1024xi32>
    %17 = arith.addi %15, %16 : vector<8x1024xi32>
    %c8_i32 = arith.constant 8 : i32
    %18 = vector.broadcast %c8_i32 : i32 to vector<8x1024xi32>
    %19 = arith.shli %17, %18 : vector<8x1024xi32>
    %20 = arith.xori %17, %19 : vector<8x1024xi32>
    %c-1640531527_i32_2 = arith.constant -1640531527 : i32
    %21 = vector.broadcast %c-1640531527_i32_2 : i32 to vector<8x1024xi32>
    %22 = arith.addi %20, %21 : vector<8x1024xi32>
    %c4_i32 = arith.constant 4 : i32
    %23 = vector.broadcast %c4_i32 : i32 to vector<8x1024xi32>
    %24 = arith.shli %22, %23 : vector<8x1024xi32>
    %25 = arith.xori %22, %24 : vector<8x1024xi32>
    %c-2048144777_i32_3 = arith.constant -2048144777 : i32
    %26 = vector.broadcast %c-2048144777_i32_3 : i32 to vector<8x1024xi32>
    %27 = arith.addi %25, %26 : vector<8x1024xi32>
    %c2_i32 = arith.constant 2 : i32
    %28 = vector.broadcast %c2_i32 : i32 to vector<8x1024xi32>
    %29 = arith.shli %27, %28 : vector<8x1024xi32>
    %30 = arith.xori %27, %29 : vector<8x1024xi32>
    %c-1640531527_i32_4 = arith.constant -1640531527 : i32
    %31 = vector.broadcast %c-1640531527_i32_4 : i32 to vector<8x1024xi32>
    %32 = arith.addi %30, %31 : vector<8x1024xi32>
    %c1_i32 = arith.constant 1 : i32
    %33 = vector.broadcast %c1_i32 : i32 to vector<8x1024xi32>
    %34 = arith.shli %32, %33 : vector<8x1024xi32>
    %35 = arith.xori %32, %34 : vector<8x1024xi32>
    %c0_i32 = arith.constant 0 : i32
    %36 = vector.broadcast %c0_i32 : i32 to vector<8x1024xi32>
    %37 = arith.cmpi sge, %35, %36 : vector<8x1024xi32>
    %cst = arith.constant 2.000000e+00 : f32
    %38 = vector.broadcast %cst : f32 to vector<8x1024xf32>
    %39 = arith.mulf %1, %38 : vector<8x1024xf32>
    %cst_5 = arith.constant 0.000000e+00 : f32
    %40 = vector.broadcast %cst_5 : f32 to vector<8x1024xf32>
    %41 = arith.select %37, %39, %40 : vector<8x1024xi1>, vector<8x1024xf32>
    %42 = arith.truncf %41 : vector<8x1024xf32> to vector<8x1024xbf16>
    %c0_6 = arith.constant 0 : index
    %c0_7 = arith.constant 0 : index
    %43 = vector.load %arg2[%c0_6, %c0_7] : memref<1024x512xbf16, #tpu.memory_space<vmem>>, vector<1024x512xbf16>
    %cst_8 = arith.constant dense<0.000000e+00> : vector<8x512xf32>
    %44 = tpu.matmul %42, %43, %cst_8 {dimension_numbers = #tpu.dot_dimension_numbers<[1], [0], [0], [1], [0, 0, 1, 1], [], []>} : vector<8x1024xbf16>, vector<1024x512xbf16>, vector<8x512xf32> -> vector<8x512xf32>
    %c0_9 = arith.constant 0 : index
    %c0_10 = arith.constant 0 : index
    %45 = vector.load %arg3[%c0_9, %c0_10] : memref<1x512xf32, #tpu.memory_space<vmem>>, vector<1x512xf32>
    %46 = vector.broadcast %45 : vector<1x512xf32> to vector<8x512xf32>
    %47 = arith.addf %44, %46 : vector<8x512xf32>
    %cst_11 = arith.constant 0.000000e+00 : f32
    %48 = vector.broadcast %cst_11 : f32 to vector<8x512xf32>
    %49 = arith.maximumf %47, %48 : vector<8x512xf32>
    %50 = tpu.iota {dimensions = array<i32: 0>} : vector<8x512xi32>
    %51 = tpu.iota {dimensions = array<i32: 1>} : vector<8x512xi32>
    %c9_i32 = arith.constant 9 : i32
    %52 = vector.broadcast %c9_i32 : i32 to vector<8x512xi32>
    %53 = arith.shli %50, %52 : vector<8x512xi32>
    %54 = arith.ori %53, %51 : vector<8x512xi32>
    %55 = vector.broadcast %0 : i32 to vector<8x512xi32>
    %56 = arith.xori %54, %55 : vector<8x512xi32>
    %c180150005_i32 = arith.constant 180150005 : i32
    %57 = vector.broadcast %c180150005_i32 : i32 to vector<8x512xi32>
    %58 = arith.addi %56, %57 : vector<8x512xi32>
    %c-1640531527_i32_12 = arith.constant -1640531527 : i32
    %59 = vector.broadcast %c-1640531527_i32_12 : i32 to vector<8x512xi32>
    %60 = arith.addi %58, %59 : vector<8x512xi32>
    %c16_i32_13 = arith.constant 16 : i32
    %61 = vector.broadcast %c16_i32_13 : i32 to vector<8x512xi32>
    %62 = arith.shli %60, %61 : vector<8x512xi32>
    %63 = arith.xori %60, %62 : vector<8x512xi32>
    %c-2048144777_i32_14 = arith.constant -2048144777 : i32
    %64 = vector.broadcast %c-2048144777_i32_14 : i32 to vector<8x512xi32>
    %65 = arith.addi %63, %64 : vector<8x512xi32>
    %c8_i32_15 = arith.constant 8 : i32
    %66 = vector.broadcast %c8_i32_15 : i32 to vector<8x512xi32>
    %67 = arith.shli %65, %66 : vector<8x512xi32>
    %68 = arith.xori %65, %67 : vector<8x512xi32>
    %c-1640531527_i32_16 = arith.constant -1640531527 : i32
    %69 = vector.broadcast %c-1640531527_i32_16 : i32 to vector<8x512xi32>
    %70 = arith.addi %68, %69 : vector<8x512xi32>
    %c4_i32_17 = arith.constant 4 : i32
    %71 = vector.broadcast %c4_i32_17 : i32 to vector<8x512xi32>
    %72 = arith.shli %70, %71 : vector<8x512xi32>
    %73 = arith.xori %70, %72 : vector<8x512xi32>
    %c-2048144777_i32_18 = arith.constant -2048144777 : i32
    %74 = vector.broadcast %c-2048144777_i32_18 : i32 to vector<8x512xi32>
    %75 = arith.addi %73, %74 : vector<8x512xi32>
    %c2_i32_19 = arith.constant 2 : i32
    %76 = vector.broadcast %c2_i32_19 : i32 to vector<8x512xi32>
    %77 = arith.shli %75, %76 : vector<8x512xi32>
    %78 = arith.xori %75, %77 : vector<8x512xi32>
    %c-1640531527_i32_20 = arith.constant -1640531527 : i32
    %79 = vector.broadcast %c-1640531527_i32_20 : i32 to vector<8x512xi32>
    %80 = arith.addi %78, %79 : vector<8x512xi32>
    %c1_i32_21 = arith.constant 1 : i32
    %81 = vector.broadcast %c1_i32_21 : i32 to vector<8x512xi32>
    %82 = arith.shli %80, %81 : vector<8x512xi32>
    %83 = arith.xori %80, %82 : vector<8x512xi32>
    %c0_i32_22 = arith.constant 0 : i32
    %84 = vector.broadcast %c0_i32_22 : i32 to vector<8x512xi32>
    %85 = arith.cmpi sge, %83, %84 : vector<8x512xi32>
    %cst_23 = arith.constant 2.000000e+00 : f32
    %86 = vector.broadcast %cst_23 : f32 to vector<8x512xf32>
    %87 = arith.mulf %49, %86 : vector<8x512xf32>
    %cst_24 = arith.constant 0.000000e+00 : f32
    %88 = vector.broadcast %cst_24 : f32 to vector<8x512xf32>
    %89 = arith.select %85, %87, %88 : vector<8x512xi1>, vector<8x512xf32>
    %90 = arith.truncf %89 : vector<8x512xf32> to vector<8x512xbf16>
    %c0_25 = arith.constant 0 : index
    %c0_26 = arith.constant 0 : index
    %91 = vector.load %arg4[%c0_25, %c0_26] : memref<512x256xbf16, #tpu.memory_space<vmem>>, vector<512x256xbf16>
    %cst_27 = arith.constant dense<0.000000e+00> : vector<8x256xf32>
    %92 = tpu.matmul %90, %91, %cst_27 {dimension_numbers = #tpu.dot_dimension_numbers<[1], [0], [0], [1], [0, 0, 1, 1], [], []>} : vector<8x512xbf16>, vector<512x256xbf16>, vector<8x256xf32> -> vector<8x256xf32>
    %c0_28 = arith.constant 0 : index
    %c0_29 = arith.constant 0 : index
    %93 = vector.load %arg5[%c0_28, %c0_29] : memref<1x256xf32, #tpu.memory_space<vmem>>, vector<1x256xf32>
    %94 = vector.broadcast %93 : vector<1x256xf32> to vector<8x256xf32>
    %95 = arith.addf %92, %94 : vector<8x256xf32>
    %c0_30 = arith.constant 0 : index
    %c0_31 = arith.constant 0 : index
    %96 = vector.load %arg6[%c0_30, %c0_31] : memref<1x256xf32, #tpu.memory_space<vmem>>, vector<1x256xf32>
    %c0_32 = arith.constant 0 : index
    %c0_33 = arith.constant 0 : index
    %97 = vector.load %arg7[%c0_32, %c0_33] : memref<1x256xf32, #tpu.memory_space<vmem>>, vector<1x256xf32>
    %cst_34 = arith.constant dense<0.000000e+00> : vector<256xf32>
    %98 = vector.multi_reduction <add>, %95, %cst_34 [0] : vector<8x256xf32> to vector<256xf32>
    %99 = vector.shape_cast %98 : vector<256xf32> to vector<1x256xf32>
    %cst_35 = arith.constant 8.000000e+00 : f32
    %100 = vector.broadcast %cst_35 : f32 to vector<1x256xf32>
    %101 = arith.divf %99, %100 : vector<1x256xf32>
    %102 = vector.broadcast %101 : vector<1x256xf32> to vector<8x256xf32>
    %103 = arith.subf %95, %102 : vector<8x256xf32>
    %104 = arith.mulf %103, %103 : vector<8x256xf32>
    %cst_36 = arith.constant dense<0.000000e+00> : vector<256xf32>
    %105 = vector.multi_reduction <add>, %104, %cst_36 [0] : vector<8x256xf32> to vector<256xf32>
    %106 = vector.shape_cast %105 : vector<256xf32> to vector<1x256xf32>
    %cst_37 = arith.constant 8.000000e+00 : f32
    %107 = vector.broadcast %cst_37 : f32 to vector<1x256xf32>
    %108 = arith.divf %106, %107 : vector<1x256xf32>
    %cst_38 = arith.constant 9.99999974E-6 : f32
    %109 = vector.broadcast %cst_38 : f32 to vector<1x256xf32>
    %110 = arith.addf %108, %109 : vector<1x256xf32>
    %111 = math.rsqrt %110 : vector<1x256xf32>
    %112 = arith.mulf %96, %111 : vector<1x256xf32>
    %113 = vector.broadcast %112 : vector<1x256xf32> to vector<8x256xf32>
    %114 = arith.mulf %95, %113 : vector<8x256xf32>
    %115 = arith.mulf %101, %112 : vector<1x256xf32>
    %116 = arith.subf %97, %115 : vector<1x256xf32>
    %117 = vector.broadcast %116 : vector<1x256xf32> to vector<8x256xf32>
    %118 = arith.addf %114, %117 : vector<8x256xf32>
    %cst_39 = arith.constant 0.000000e+00 : f32
    %119 = vector.broadcast %cst_39 : f32 to vector<8x256xf32>
    %120 = arith.maximumf %118, %119 : vector<8x256xf32>
    %121 = tpu.iota {dimensions = array<i32: 0>} : vector<8x256xi32>
    %122 = tpu.iota {dimensions = array<i32: 1>} : vector<8x256xi32>
    %c8_i32_40 = arith.constant 8 : i32
    %123 = vector.broadcast %c8_i32_40 : i32 to vector<8x256xi32>
    %124 = arith.shli %121, %123 : vector<8x256xi32>
    %125 = arith.ori %124, %122 : vector<8x256xi32>
    %126 = vector.broadcast %0 : i32 to vector<8x256xi32>
    %127 = arith.xori %125, %126 : vector<8x256xi32>
    %c133474243_i32 = arith.constant 133474243 : i32
    %128 = vector.broadcast %c133474243_i32 : i32 to vector<8x256xi32>
    %129 = arith.addi %127, %128 : vector<8x256xi32>
    %c-1640531527_i32_41 = arith.constant -1640531527 : i32
    %130 = vector.broadcast %c-1640531527_i32_41 : i32 to vector<8x256xi32>
    %131 = arith.addi %129, %130 : vector<8x256xi32>
    %c16_i32_42 = arith.constant 16 : i32
    %132 = vector.broadcast %c16_i32_42 : i32 to vector<8x256xi32>
    %133 = arith.shli %131, %132 : vector<8x256xi32>
    %134 = arith.xori %131, %133 : vector<8x256xi32>
    %c-2048144777_i32_43 = arith.constant -2048144777 : i32
    %135 = vector.broadcast %c-2048144777_i32_43 : i32 to vector<8x256xi32>
    %136 = arith.addi %134, %135 : vector<8x256xi32>
    %c8_i32_44 = arith.constant 8 : i32
    %137 = vector.broadcast %c8_i32_44 : i32 to vector<8x256xi32>
    %138 = arith.shli %136, %137 : vector<8x256xi32>
    %139 = arith.xori %136, %138 : vector<8x256xi32>
    %c-1640531527_i32_45 = arith.constant -1640531527 : i32
    %140 = vector.broadcast %c-1640531527_i32_45 : i32 to vector<8x256xi32>
    %141 = arith.addi %139, %140 : vector<8x256xi32>
    %c4_i32_46 = arith.constant 4 : i32
    %142 = vector.broadcast %c4_i32_46 : i32 to vector<8x256xi32>
    %143 = arith.shli %141, %142 : vector<8x256xi32>
    %144 = arith.xori %141, %143 : vector<8x256xi32>
    %c-2048144777_i32_47 = arith.constant -2048144777 : i32
    %145 = vector.broadcast %c-2048144777_i32_47 : i32 to vector<8x256xi32>
    %146 = arith.addi %144, %145 : vector<8x256xi32>
    %c2_i32_48 = arith.constant 2 : i32
    %147 = vector.broadcast %c2_i32_48 : i32 to vector<8x256xi32>
    %148 = arith.shli %146, %147 : vector<8x256xi32>
    %149 = arith.xori %146, %148 : vector<8x256xi32>
    %c-1640531527_i32_49 = arith.constant -1640531527 : i32
    %150 = vector.broadcast %c-1640531527_i32_49 : i32 to vector<8x256xi32>
    %151 = arith.addi %149, %150 : vector<8x256xi32>
    %c1_i32_50 = arith.constant 1 : i32
    %152 = vector.broadcast %c1_i32_50 : i32 to vector<8x256xi32>
    %153 = arith.shli %151, %152 : vector<8x256xi32>
    %154 = arith.xori %151, %153 : vector<8x256xi32>
    %c0_i32_51 = arith.constant 0 : i32
    %155 = vector.broadcast %c0_i32_51 : i32 to vector<8x256xi32>
    %156 = arith.cmpi sge, %154, %155 : vector<8x256xi32>
    %cst_52 = arith.constant 2.000000e+00 : f32
    %157 = vector.broadcast %cst_52 : f32 to vector<8x256xf32>
    %158 = arith.mulf %120, %157 : vector<8x256xf32>
    %cst_53 = arith.constant 0.000000e+00 : f32
    %159 = vector.broadcast %cst_53 : f32 to vector<8x256xf32>
    %160 = arith.select %156, %158, %159 : vector<8x256xi1>, vector<8x256xf32>
    %161 = arith.truncf %160 : vector<8x256xf32> to vector<8x256xbf16>
    %c0_54 = arith.constant 0 : index
    %c0_55 = arith.constant 0 : index
    %162 = vector.load %arg8[%c0_54, %c0_55] : memref<256x128xbf16, #tpu.memory_space<vmem>>, vector<256x128xbf16>
    %cst_56 = arith.constant dense<0.000000e+00> : vector<8x128xf32>
    %163 = tpu.matmul %161, %162, %cst_56 {dimension_numbers = #tpu.dot_dimension_numbers<[1], [0], [0], [1], [0, 0, 1, 1], [], []>} : vector<8x256xbf16>, vector<256x128xbf16>, vector<8x128xf32> -> vector<8x128xf32>
    %c0_57 = arith.constant 0 : index
    %c0_58 = arith.constant 0 : index
    %164 = vector.load %arg9[%c0_57, %c0_58] : memref<1x128xf32, #tpu.memory_space<vmem>>, vector<1x128xf32>
    %165 = vector.broadcast %164 : vector<1x128xf32> to vector<8x128xf32>
    %166 = arith.addf %163, %165 : vector<8x128xf32>
    %c0_59 = arith.constant 0 : index
    %c0_60 = arith.constant 0 : index
    %167 = vector.load %arg10[%c0_59, %c0_60] : memref<1x128xf32, #tpu.memory_space<vmem>>, vector<1x128xf32>
    %c0_61 = arith.constant 0 : index
    %c0_62 = arith.constant 0 : index
    %168 = vector.load %arg11[%c0_61, %c0_62] : memref<1x128xf32, #tpu.memory_space<vmem>>, vector<1x128xf32>
    %cst_63 = arith.constant dense<0.000000e+00> : vector<128xf32>
    %169 = vector.multi_reduction <add>, %166, %cst_63 [0] : vector<8x128xf32> to vector<128xf32>
    %170 = vector.shape_cast %169 : vector<128xf32> to vector<1x128xf32>
    %cst_64 = arith.constant 8.000000e+00 : f32
    %171 = vector.broadcast %cst_64 : f32 to vector<1x128xf32>
    %172 = arith.divf %170, %171 : vector<1x128xf32>
    %173 = vector.broadcast %172 : vector<1x128xf32> to vector<8x128xf32>
    %174 = arith.subf %166, %173 : vector<8x128xf32>
    %175 = arith.mulf %174, %174 : vector<8x128xf32>
    %cst_65 = arith.constant dense<0.000000e+00> : vector<128xf32>
    %176 = vector.multi_reduction <add>, %175, %cst_65 [0] : vector<8x128xf32> to vector<128xf32>
    %177 = vector.shape_cast %176 : vector<128xf32> to vector<1x128xf32>
    %cst_66 = arith.constant 8.000000e+00 : f32
    %178 = vector.broadcast %cst_66 : f32 to vector<1x128xf32>
    %179 = arith.divf %177, %178 : vector<1x128xf32>
    %cst_67 = arith.constant 9.99999974E-6 : f32
    %180 = vector.broadcast %cst_67 : f32 to vector<1x128xf32>
    %181 = arith.addf %179, %180 : vector<1x128xf32>
    %182 = math.rsqrt %181 : vector<1x128xf32>
    %183 = arith.mulf %167, %182 : vector<1x128xf32>
    %184 = vector.broadcast %183 : vector<1x128xf32> to vector<8x128xf32>
    %185 = arith.mulf %166, %184 : vector<8x128xf32>
    %186 = arith.mulf %172, %183 : vector<1x128xf32>
    %187 = arith.subf %168, %186 : vector<1x128xf32>
    %188 = vector.broadcast %187 : vector<1x128xf32> to vector<8x128xf32>
    %189 = arith.addf %185, %188 : vector<8x128xf32>
    %cst_68 = arith.constant 0.000000e+00 : f32
    %190 = vector.broadcast %cst_68 : f32 to vector<8x128xf32>
    %191 = arith.maximumf %189, %190 : vector<8x128xf32>
    %c0_69 = arith.constant 0 : index
    %c0_70 = arith.constant 0 : index
    %192 = vector.load %arg12[%c0_69, %c0_70] : memref<8x128xf32, #tpu.memory_space<vmem>>, vector<8x128xf32>
    tpu.vector_store %arg12[%c0_69, %c0_70], %191 {strides = array<i32>} : memref<8x128xf32, #tpu.memory_space<vmem>>, vector<8x128xf32>,
    return
  }
}

</mosaic_0001>

<bundles_post_ra>
// kernel: regressor_r18.1
= control target key start
LH: loop header
LB: loop body
LE: loop exit
PB: predicated region body
PF: predicated region fallthrough
CT: control target
= control target key end

     0   :  { %18 = vsyncpa [#allocation4], 0  ;;  %s4554_s0 = inlined_call_operand.<no memory space> [shape: s32[1], index: 0, kind: input, shape index: {}]   ;;  %s4555_s1 = inlined_call_operand.vmem [shape: f32[8,1024], index: 1, kind: input, shape index: {}]   ;;  %s4556_s2 = inlined_call_operand.hbm [shape: bf16[1024,512], index: 2, kind: input, shape index: {}]   ;;  %s4557_s3 = inlined_call_operand.vmem [shape: f32[1,512], index: 3, kind: input, shape index: {}]   ;;  %s4558_s4 = inlined_call_operand.hbm [shape: bf16[512,256], index: 4, kind: input, shape index: {}]   ;;  %s4559_s5 = inlined_call_operand.vmem [shape: f32[1,256], index: 5, kind: input, shape index: {}]   ;;  %s4560_s6 = inlined_call_operand.vmem [shape: f32[1,256], index: 6, kind: input, shape index: {}]   ;;  %s4561_s7 = inlined_call_operand.vmem [shape: f32[1,256], index: 7, kind: input, shape index: {}]   ;;  %s4562_s8 = inlined_call_operand.vmem [shape: bf16[256,128], index: 8, kind: input, shape index: {}]   ;;  %s4563_s9 = inlined_call_operand.vmem [shape: f32[1,128], index: 9, kind: input, shape index: {}]   ;;  %s4564_s10 = inlined_call_operand.vmem [shape: f32[1,128], index: 10, kind: input, shape index: {}]   ;;  %s4565_s11 = inlined_call_operand.vmem [shape: f32[1,128], index: 11, kind: input, shape index: {}]   ;;  %s4566_s12 = inlined_call_operand.hbm [shape: f32[8,128], index: 12, kind: output, shape index: {}]  }
   0x1   :  { %19 = vsyncpa [#allocation7], 0 }
   0x2   :  { %20 = vsyncpa [#allocation5], 0  ;;  %s4148_s21 = smov [#allocation3]   ;;  %s4076_s25 = scalar_lea.hbm %s4556_s2, 32768 }
   0x3   :  { %s30_s22 = sshll.u32 %s4148_s21, 4  ;;  %p4077_p0 = scmp.ne.s32.totalorder %s4556_s2, %s4076_s25  ;;  %s31_s22 = int_to_ptr.vmem [resolvable:$true] %s30_s22 }
   0x4   :  { %p4080_p1 = scmp.lt.u32.totalorder %s4076_s25, %s4556_s2 }
   0x6   :  { %p4082_p2 = pnand %p4080_p1, %p4077_p0 }
   0x8   :  { %4085 = shalt.err (!%p4082_p2)
}
   0x9   :  { %s4086_s30 = scalar_lea.vmem %s31_s22, 32768  ;;  %p4091_p4 = scmp.lt.s32.totalorder %s31_s22, %s31_s22 }
   0xa   :  { %p4087_p3 = scmp.ne.s32.totalorder %s31_s22, %s4086_s30  ;;  %p4092_p5 = scmp.lt.s32.totalorder %s4086_s30, %s4086_s30 }
   0xc   :  { %p4093_p6 = por %p4092_p5, %p4091_p4 }
   0xe   :  { %p4094_p7 = pnand %p4093_p6, %p4087_p3 }
  0x10   :  { %4097 = shalt.err (!%p4094_p7)
}
  0x11   :  { %s4149_s13 = smov 256   ;;  %s4150_s14 = smov 16  }
  0x12   :  { %36 = dma.hbm_to_vmem [thread:$0]  %s4556_s2, 32768, %s31_s22, [#allocation4], %s4149_s13, %s4149_s13, %s4150_s14  }
  0x13   :  { %s4151_s17 = smov [#allocation6]   ;;  %s4098_s21 = scalar_lea.hbm %s4558_s4, 8192 }
  0x14   :  { %s44_s18 = sshll.u32 %s4151_s17, 4  ;;  %p4099_p8 = scmp.ne.s32.totalorder %s4558_s4, %s4098_s21  ;;  %s45_s18 = int_to_ptr.vmem [resolvable:$true] %s44_s18 }
  0x15   :  { %p4102_p9 = scmp.lt.u32.totalorder %s4098_s21, %s4558_s4 }
  0x17   :  { %p4104_p10 = pnand %p4102_p9, %p4099_p8 }
  0x19   :  { %4107 = shalt.err (!%p4104_p10)
}
  0x1a   :  { %s4108_s27 = scalar_lea.vmem %s45_s18, 8192  ;;  %p4113_p12 = scmp.lt.s32.totalorder %s45_s18, %s45_s18 }
  0x1b   :  { %p4109_p11 = scmp.ne.s32.totalorder %s45_s18, %s4108_s27  ;;  %p4114_p13 = scmp.lt.s32.totalorder %s4108_s27, %s4108_s27 }
  0x1d   :  { %p4115_p0 = por %p4114_p13, %p4113_p12 }
  0x1f   :  { %p4116_p1 = pnand %p4115_p0, %p4109_p11 }
  0x21   :  { %4119 = shalt.err (!%p4116_p1)
}
  0x22   :  { %s4152_s2 = smov 128   ;;  %s4153_s22 = smov 8  }
  0x23   :  { %50 = dma.hbm_to_vmem [thread:$0]  %s4558_s4, 8192, %s45_s18, [#allocation7], %s4152_s2, %s4152_s2, %s4153_s22  }
  0x24   :  { %4142 = dma.done.wait [#allocation4], 32768  }
  0x25   :  { %4143 = vsyncadd [#allocation4], 4294934528 }
  0x26   :  { %4144 = dma.done.wait [#allocation7], 8192  }
  0x27   :  { %4145 = vsyncadd [#allocation7], 4294959104  ;;  %v81_v0 = vlaneseq  ;;  %v4258_v5 = vstv %s4554_s0  ;;  %v3574_v8 = vld [vmem:[#allocation3 + $0x4] ss:$16 sps:$4 sm:$0xff]   ;;  %v3578_v11 = vld [vmem:[#allocation3] ss:$16 sps:$4 sm:$0xff]  }
  0x28   :  { %v3576_v9 = vld [vmem:[#allocation3 + $0x204] ss:$16 sps:$4 sm:$0xff]   ;;  %1828 = vmatprep.subr.bf16.mxu1 %v3574_v8  ;;  %v3579_v12 = vld [vmem:[#allocation3 + $0x200] ss:$16 sps:$4 sm:$0xff]   ;;  %s4155_s24 = smov [#allocation8]  }
  0x29   :  { %v4245_v1 = vshrl.u32 %v81_v0, 7  ;;  %v4247_v2 = vand.u32 127, %v81_v0  ;;  %1869 = vmatprep.subr.bf16.mxu0 %v3576_v9  ;;  %v3580_v14 = vld [vmem:[#allocation3 + $0x24] ss:$16 sps:$4 sm:$0xff]   ;;  %1829 = vmatpush1.bf16.msra.mxu1 %v3578_v11  ;;  %v3584_v17 = vld [vmem:[#allocation3 + $0x20] ss:$16 sps:$4 sm:$0xff]  }
  0x2a   :  { %1870 = vmatpush1.bf16.msra.mxu0 %v3579_v12  ;;  %v3582_v16 = vld [vmem:[#allocation3 + $0x224] ss:$16 sps:$4 sm:$0xff]   ;;  %1830 = vmatprep.subr.bf16.mxu1 %v3580_v14  ;;  %v3585_v19 = vld [vmem:[#allocation3 + $0x220] ss:$16 sps:$4 sm:$0xff]   ;;  %s3099_s25 = sshll.u32 %s4155_s24, 4  ;;  %s3100_s25 = int_to_ptr.vmem [resolvable:$true] %s3099_s25 }
  0x2b   :  { %v4250_v3 = vadd.s32 128, %v4247_v2  ;;  %v4253_v4 = vshll.u32 %v4245_v1, 10  ;;  %v4267_v18 = vadd.s32 384, %v4247_v2  ;;  %1871 = vmatprep.subr.bf16.mxu0 %v3582_v16  ;;  %v3586_v21 = vld [vmem:[#allocation3 + $0x44] ss:$16 sps:$4 sm:$0xff]   ;;  %p4125_p3 = scmp.lt.s32.totalorder %s3100_s25, %s3100_s25 }
  0x2c   :  { %v3588_v23 = vld [vmem:[#allocation3 + $0x244] ss:$16 sps:$4 sm:$0xff]   ;;  %v3590_v24 = vld [vmem:[#allocation3 + $0x40] ss:$16 sps:$4 sm:$0xff]  }
  0x2d   :  { %v94_v6 = vor.u32 %v4253_v4, %v4250_v3  ;;  %v93_v7 = vor.u32 %v4253_v4, %v4247_v2  ;;  %v3591_v25 = vld [vmem:[#allocation3 + $0x240] ss:$16 sps:$4 sm:$0xff]   ;;  %1831 = vmatpush1.bf16.msra.mxu1 %v3584_v17  ;;  %v3592_v26 = vld [vmem:[#allocation3 + $0x64] ss:$16 sps:$4 sm:$0xff]   ;;  %v96_v31 = vor.u32 %v4253_v4, %v4267_v18 }
  0x2e   :  { %1872 = vmatpush1.bf16.msra.mxu0 %v3585_v19  ;;  %1832 = vmatprep.subr.bf16.mxu1 %v3586_v21  ;;  %v3594_v28 = vld [vmem:[#allocation3 + $0x264] ss:$16 sps:$4 sm:$0xff]   ;;  %v3596_v32 = vld [vmem:[#allocation3 + $0x60] ss:$16 sps:$4 sm:$0xff]   ;;  %v4273_v21 = vadd.s32 256, %v4247_v2 }
  0x2f   :  { %v103_v10 = vxor.u32 %v4258_v5, %v94_v6  ;;  %v102_v13 = vxor.u32 %v4258_v5, %v93_v7  ;;  %1873 = vmatprep.subr.bf16.mxu0 %v3588_v23  ;;  %v3597_v34 = vld [vmem:[#allocation3 + $0x260] ss:$16 sps:$4 sm:$0xff]   ;;  %v3598_v35 = vld [vmem:[#allocation3 + $0x84] ss:$16 sps:$4 sm:$0xff]   ;;  %v105_v39 = vxor.u32 %v4258_v5, %v96_v31 }
  0x30   :  { %v3600_v36 = vld [vmem:[#allocation3 + $0x284] ss:$16 sps:$4 sm:$0xff]   ;;  %v3602_v40 = vld [vmem:[#allocation3 + $0x80] ss:$16 sps:$4 sm:$0xff]  }
  0x31   :  { %v111_v15 = vadd.s32 305419889, %v103_v10  ;;  %v110_v22 = vadd.s32 305419889, %v102_v13  ;;  %1833 = vmatpush1.bf16.msra.mxu1 %v3590_v24  ;;  %v3603_v41 = vld [vmem:[#allocation3 + $0x280] ss:$16 sps:$4 sm:$0xff]  }
  0x32   :  { %1874 = vmatpush1.bf16.msra.mxu0 %v3591_v25  ;;  %1834 = vmatprep.subr.bf16.mxu1 %v3592_v26  ;;  %v3604_v42 = vld [vmem:[#allocation3 + $0xa4] ss:$16 sps:$4 sm:$0xff]   ;;  %v113_v47 = vadd.s32 305419889, %v105_v39  ;;  %v3608_v48 = vld [vmem:[#allocation3 + $0xa0] ss:$16 sps:$4 sm:$0xff]  }
  0x33   :  { %v119_v20 = vadd.s32 2654435769, %v111_v15  ;;  %v118_v29 = vadd.s32 2654435769, %v110_v22  ;;  %1875 = vmatprep.subr.bf16.mxu0 %v3594_v28  ;;  %v3606_v44 = vld [vmem:[#allocation3 + $0x2a4] ss:$16 sps:$4 sm:$0xff]  }
  0x34   :  { %v3609_v50 = vld [vmem:[#allocation3 + $0x2a0] ss:$16 sps:$4 sm:$0xff]   ;;  %v3610_v51 = vld [vmem:[#allocation3 + $0xc4] ss:$16 sps:$4 sm:$0xff]   ;;  %v121_v55 = vadd.s32 2654435769, %v113_v47 }
  0x35   :  { %v127_v27 = vshll.u32 %v119_v20, 16  ;;  %v126_v33 = vshll.u32 %v118_v29, 16  ;;  %1835 = vmatpush1.bf16.msra.mxu1 %v3596_v32  ;;  %v3612_v52 = vld [vmem:[#allocation3 + $0x2c4] ss:$16 sps:$4 sm:$0xff]   ;;  %v3614_v56 = vld [vmem:[#allocation3 + $0xc0] ss:$16 sps:$4 sm:$0xff]  }
  0x36   :  { %1876 = vmatpush1.bf16.msra.mxu0 %v3597_v34  ;;  %1836 = vmatprep.subr.bf16.mxu1 %v3598_v35  ;;  %v3615_v57 = vld [vmem:[#allocation3 + $0x2c0] ss:$16 sps:$4 sm:$0xff]   ;;  %v3616_v58 = vld [vmem:[#allocation3 + $0xe4] ss:$16 sps:$4 sm:$0xff]   ;;  %v129_v60 = vshll.u32 %v121_v55, 16  ;;  %v89_v32 = vadd.s32 640, %v4247_v2 }
  0x37   :  { %v135_v30 = vxor.u32 %v127_v27, %v119_v20  ;;  %v134_v38 = vxor.u32 %v126_v33, %v118_v29  ;;  %1877 = vmatprep.subr.bf16.mxu0 %v3600_v36  ;;  %v3618_v61 = vld [vmem:[#allocation3 + $0x2e4] ss:$16 sps:$4 sm:$0xff]   ;;  %v3620_v63 = vld [vmem:[#allocation3 + $0xe0] ss:$16 sps:$4 sm:$0xff]  }
  0x38   :  { %v137_v6 = vxor.u32 %v129_v60, %v121_v55  ;;  %v3621_v7 = vld [vmem:[#allocation3 + $0x2e0] ss:$16 sps:$4 sm:$0xff]   ;;  %v3622_v8 = vld [vmem:[#allocation3 + $0x104] ss:$16 sps:$4 sm:$0xff]  }
  0x39   :  { %v143_v37 = vadd.s32 2246822519, %v135_v30  ;;  %v142_v45 = vadd.s32 2246822519, %v134_v38  ;;  %1837 = vmatpush1.bf16.msra.mxu1 %v3602_v40  ;;  %v3624_v9 = vld [vmem:[#allocation3 + $0x304] ss:$16 sps:$4 sm:$0xff]   ;;  %v95_v30 = vor.u32 %v4253_v4, %v4273_v21 }
  0x3a   :  { %1878 = vmatpush1.bf16.msra.mxu0 %v3603_v41  ;;  %1838 = vmatprep.subr.bf16.mxu1 %v3604_v42  ;;  %v145_v12 = vadd.s32 2246822519, %v137_v6  ;;  %v3626_v13 = vld [vmem:[#allocation3 + $0x100] ss:$16 sps:$4 sm:$0xff]   ;;  %v3628_v15 = vld [vmem:[#allocation3 + $0x124] ss:$16 sps:$4 sm:$0xff]  }
  0x3b   :  { %v151_v43 = vshll.u32 %v143_v37, 8  ;;  %v150_v49 = vshll.u32 %v142_v45, 8  ;;  %1879 = vmatprep.subr.bf16.mxu0 %v3606_v44  ;;  %v3627_v14 = vld [vmem:[#allocation3 + $0x300] ss:$16 sps:$4 sm:$0xff]   ;;  %v3630_v19 = vld [vmem:[#allocation3 + $0x324] ss:$16 sps:$4 sm:$0xff]   ;;  %v104_v40 = vxor.u32 %v4258_v5, %v95_v30  ;;  %v98_v44 = vor.u32 %v4253_v4, %v89_v32 }
  0x3c   :  { %v153_v17 = vshll.u32 %v145_v12, 8  ;;  %v3632_v22 = vld [vmem:[#allocation3 + $0x120] ss:$16 sps:$4 sm:$0xff]   ;;  %v3634_v26 = vld [vmem:[#allocation3 + $0x144] ss:$16 sps:$4 sm:$0xff]   ;;  %v74_v41 = vld [vmem:[%s4555_s1 + $0x8] sm:$0xff] }
  0x3d   :  { %v159_v46 = vxor.u32 %v151_v43, %v143_v37  ;;  %v158_v54 = vxor.u32 %v150_v49, %v142_v45  ;;  %1839 = vmatpush1.bf16.msra.mxu1 %v3608_v48  ;;  %v3633_v25 = vld [vmem:[#allocation3 + $0x320] ss:$16 sps:$4 sm:$0xff]   ;;  %v3636_v27 = vld [vmem:[#allocation3 + $0x344] ss:$16 sps:$4 sm:$0xff]  }
  0x3e   :  { %1880 = vmatpush1.bf16.msra.mxu0 %v3609_v50  ;;  %1840 = vmatprep.subr.bf16.mxu1 %v3610_v51  ;;  %v161_v24 = vxor.u32 %v153_v17, %v145_v12  ;;  %v3638_v33 = vld [vmem:[#allocation3 + $0x140] ss:$16 sps:$4 sm:$0xff]   ;;  %v3640_v35 = vld [vmem:[#allocation3 + $0x164] ss:$16 sps:$4 sm:$0xff]  }
  0x3f   :  { %v167_v53 = vadd.s32 2654435769, %v159_v46  ;;  %1881 = vmatprep.subr.bf16.mxu0 %v3612_v52  ;;  %v166_v62 = vadd.s32 2654435769, %v158_v54  ;;  %v3639_v34 = vld [vmem:[#allocation3 + $0x340] ss:$16 sps:$4 sm:$0xff]  }
  0x40   :  { %v169_v31 = vadd.s32 2654435769, %v161_v24  ;;  %v3642_v38 = vld [vmem:[#allocation3 + $0x364] ss:$16 sps:$4 sm:$0xff]   ;;  %v3644_v45 = vld [vmem:[#allocation3 + $0x160] ss:$16 sps:$4 sm:$0xff]  }
  0x41   :  { %v175_v59 = vshll.u32 %v167_v53, 4  ;;  %1841 = vmatpush1.bf16.msra.mxu1 %v3614_v56  ;;  %v174_v11 = vshll.u32 %v166_v62, 4  ;;  %v247_v46 = vmul.f32 2.0, %v74_v41  ;;  %v3645_v47 = vld [vmem:[#allocation3 + $0x360] ss:$16 sps:$4 sm:$0xff]   ;;  %v76_v56 = vld [vmem:[%s4555_s1 + $0x18] sm:$0xff] }
  0x42   :  { %1882 = vmatpush1.bf16.msra.mxu0 %v3615_v57  ;;  %1842 = vmatprep.subr.bf16.mxu1 %v3616_v58  ;;  %v177_v37 = vshll.u32 %v169_v31, 4  ;;  %v3646_v49 = vld [vmem:[#allocation3 + $0x184] ss:$16 sps:$4 sm:$0xff]   ;;  %v112_v54 = vadd.s32 305419889, %v104_v40  ;;  %v107_v58 = vxor.u32 %v4258_v5, %v98_v44  ;;  %v249_v6 = vmul.f32 2.0, %v76_v56 }
  0x43   :  { %v183_v0 = vxor.u32 %v175_v59, %v167_v53  ;;  %1883 = vmatprep.subr.bf16.mxu0 %v3618_v61  ;;  %v182_v20 = vxor.u32 %v174_v11, %v166_v62  ;;  %v3648_v50 = vld [vmem:[#allocation3 + $0x384] ss:$16 sps:$4 sm:$0xff]   ;;  %v4287_v52 = vpack.c.bf16 %v247_v46, %v247_v46  ;;  %v3650_v55 = vld [vmem:[#allocation3 + $0x180] ss:$16 sps:$4 sm:$0xff]   ;;  %v3675_v40 = vld [vmem:[#allocation3 + $0xc] ss:$16 sps:$4 sm:$0xff]  }
  0x44   :  { %v185_v43 = vxor.u32 %v177_v37, %v169_v31  ;;  %v3651_v59 = vld [vmem:[#allocation3 + $0x380] ss:$16 sps:$4 sm:$0xff]   ;;  %v3652_v60 = vld [vmem:[#allocation3 + $0x1a4] ss:$16 sps:$4 sm:$0xff]   ;;  %v120_v61 = vadd.s32 2654435769, %v112_v54 }
  0x45   :  { %v191_v10 = vadd.s32 2246822519, %v183_v0  ;;  %1843 = vmatpush1.bf16.msra.mxu1 %v3620_v63  ;;  %v190_v29 = vadd.s32 2246822519, %v182_v20  ;;  %v3654_v62 = vld [vmem:[#allocation3 + $0x3a4] ss:$16 sps:$4 sm:$0xff]  }
  0x46   :  { %1884 = vmatpush1.bf16.msra.mxu0 %v3621_v7  ;;  %1844 = vmatprep.subr.bf16.mxu1 %v3622_v8  ;;  %v193_v48 = vadd.s32 2246822519, %v185_v43  ;;  %v128_v7 = vshll.u32 %v120_v61, 16  ;;  %v3657_v11 = vld [vmem:[#allocation3 + $0x3a0] ss:$16 sps:$4 sm:$0xff]  }
  0x47   :  { %v199_v16 = vshll.u32 %v191_v10, 2  ;;  %1885 = vmatprep.subr.bf16.mxu0 %v3624_v9  ;;  %v198_v39 = vshll.u32 %v190_v29, 2  ;;  %v115_v9 = vadd.s32 305419889, %v107_v58  ;;  %v3663_v24 = vld [vmem:[#allocation3 + $0x3c0] ss:$16 sps:$4 sm:$0xff]  }
  0x48   :  { %v201_v57 = vshll.u32 %v193_v48, 2  ;;  %v136_v12 = vxor.u32 %v128_v7, %v120_v61  ;;  %v3672_v37 = vld [vmem:[#allocation3 + $0x404] ss:$16 sps:$4 sm:$0xff]   ;;  %v3673_v43 = vld [vmem:[#allocation3 + $0x8] ss:$16 sps:$4 sm:$0xff]  }
  0x49   :  { %v207_v23 = vxor.u32 %v199_v16, %v191_v10  ;;  %1845 = vmatpush1.bf16.msra.mxu1 %v3626_v13  ;;  %v206_v53 = vxor.u32 %v198_v39, %v190_v29  ;;  %v3656_v10 = vld [vmem:[#allocation3 + $0x1a0] ss:$16 sps:$4 sm:$0xff]   ;;  %v3658_v13 = vld [vmem:[#allocation3 + $0x1c4] ss:$16 sps:$4 sm:$0xff]   ;;  %v88_v39 = vadd.s32 512, %v4247_v2 }
  0x4a   :  { %1886 = vmatpush1.bf16.msra.mxu0 %v3627_v14  ;;  %1846 = vmatprep.subr.bf16.mxu1 %v3628_v15  ;;  %v209_v63 = vxor.u32 %v201_v57, %v193_v48  ;;  %v3660_v15 = vld [vmem:[#allocation3 + $0x3c4] ss:$16 sps:$4 sm:$0xff]   ;;  %v144_v17 = vadd.s32 2246822519, %v136_v12  ;;  %v3679_v56 = vld [vmem:[#allocation3 + $0x28] ss:$16 sps:$4 sm:$0xff]  }
  0x4b   :  { %1887 = vmatprep.subr.bf16.mxu0 %v3630_v19  ;;  %v215_v28 = vadd.s32 2654435769, %v207_v23  ;;  %v214_v0 = vadd.s32 2654435769, %v206_v53  ;;  %v3662_v19 = vld [vmem:[#allocation3 + $0x1c0] ss:$16 sps:$4 sm:$0xff]   ;;  %v97_v48 = vor.u32 %v4253_v4, %v88_v39 }
  0x4c   :  { %v217_v8 = vadd.s32 2654435769, %v209_v63  ;;  %v123_v23 = vadd.s32 2654435769, %v115_v9  ;;  %v75_v53 = vld [vmem:[%s4555_s1 + $0x10] sm:$0xff] }
  0x4d   :  { %1847 = vmatpush1.bf16.msra.mxu1 %v3632_v22  ;;  %v223_v36 = vshll.u32 %v215_v28, 1  ;;  %v222_v16 = vshll.u32 %v214_v0, 1  ;;  %v4296_v22 = vpack.c.bf16 %v249_v6, %v249_v6  ;;  %v106_v58 = vxor.u32 %v4258_v5, %v97_v48  ;;  %v3693_v9 = vld [vmem:[#allocation3 + $0x6c] ss:$16 sps:$4 sm:$0xff]   ;;  %v3691_v12 = vld [vmem:[#allocation3 + $0x68] ss:$16 sps:$4 sm:$0xff]  }
  0x4e   :  { %1888 = vmatpush1.bf16.msra.mxu0 %v3633_v25  ;;  %1848 = vmatprep.subr.bf16.mxu1 %v3634_v26  ;;  %v225_v14 = vshll.u32 %v217_v8, 1  ;;  %v152_v25 = vshll.u32 %v144_v17, 8  ;;  %v3664_v26 = vld [vmem:[#allocation3 + $0x1e4] ss:$16 sps:$4 sm:$0xff]   ;;  %v131_v32 = vshll.u32 %v123_v23, 16 }
  0x4f   :  { %1889 = vmatprep.subr.bf16.mxu0 %v3636_v27  ;;  %v231_v42 = vxor.u32 %v223_v36, %v215_v28  ;;  %v73_v27 = vld [vmem:[%s4555_s1] sm:$0xff]  ;;  %v230_v29 = vxor.u32 %v222_v16, %v214_v0  ;;  %v3685_v0 = vld [vmem:[#allocation3 + $0x48] ss:$16 sps:$4 sm:$0xff]   ;;  %v114_v7 = vadd.s32 305419889, %v106_v58 }
  0x50   :  { %v233_v20 = vxor.u32 %v225_v14, %v217_v8  ;;  %v3666_v28 = vld [vmem:[#allocation3 + $0x3e4] ss:$16 sps:$4 sm:$0xff]   ;;  %v160_v31 = vxor.u32 %v152_v25, %v144_v17  ;;  %v3699_v16 = vld [vmem:[#allocation3 + $0x8c] ss:$16 sps:$4 sm:$0xff]   ;;  %v3694_v48 = vld [vmem:[#allocation3 + $0x480] ss:$16 sps:$4 sm:$0xff]  }
  0x51   :  { %1849 = vmatpush1.bf16.msra.mxu1 %v3638_v33  ;;  %vm239_vm0 = vcmp.ge.s32.totalorder %v231_v42, 0  ;;  %v3668_v33 = vld [vmem:[#allocation3 + $0x1e0] ss:$16 sps:$4 sm:$0xff]   ;;  %vm238_vm4 = vcmp.ge.s32.totalorder %v230_v29, 0  ;;  %v3781_v46 = vld [vmem:[#allocation3 + $0x248] ss:$16 sps:$4 sm:$0xff]  }
  0x52   :  { %1890 = vmatpush1.bf16.msra.mxu0 %v3639_v34  ;;  %1850 = vmatprep.subr.bf16.mxu1 %v3640_v35  ;;  %vm4283_vm1 = vmpackc.low %vm239_vm0, %vm239_vm0  ;;  %vm241_vm2 = vcmp.ge.s32.totalorder %v233_v20, 0  ;;  %v3669_v34 = vld [vmem:[#allocation3 + $0x3e0] ss:$16 sps:$4 sm:$0xff]   ;;  %v246_v35 = vmul.f32 2.0, %v73_v27  ;;  %v168_v36 = vadd.s32 2654435769, %v160_v31 }
  0x53   :  { %1891 = vmatprep.subr.bf16.mxu0 %v3642_v38  ;;  %3367 = vmatprep.mubr.msk.bf16.mxu1 %vm4283_vm1, %v4287_v52  ;;  %vm4301_vm3 = vmpackc.low %vm241_vm2, %vm241_vm2  ;;  %v139_v38 = vxor.u32 %v131_v32, %v123_v23  ;;  %v3697_v23 = vld [vmem:[#allocation3 + $0x88] ss:$16 sps:$4 sm:$0xff]   ;;  %v3684_v27 = vld [vmem:[#allocation3 + $0x444] ss:$16 sps:$4 sm:$0xff]  }
  0x54   :  { %3373 = vmatprep.mubr.msk.bf16.mxu0 %vm4301_vm3, %v4296_v22  ;;  %v176_v41 = vshll.u32 %v168_v36, 4  ;;  %v4309_v42 = vpack.c.bf16 %v246_v35, %v246_v35  ;;  %vm4312_vm5 = vmpackc.low %vm238_vm4, %vm238_vm4  ;;  %v3682_v29 = vld [vmem:[#allocation3 + $0x440] ss:$16 sps:$4 sm:$0xff]   ;;  %v3703_v32 = vld [vmem:[#allocation3 + $0xa8] ss:$16 sps:$4 sm:$0xff]  }
  0x55   :  { %1851 = vmatpush1.bf16.msra.mxu1 %v3644_v45  ;;  %v91_v45 = vadd.s32 896, %v4247_v2  ;;  %v3690_v35 = vld [vmem:[#allocation3 + $0x464] ss:$16 sps:$4 sm:$0xff]   ;;  %v3868_v17 = vld [vmem:[#allocation3 + $0x448] ss:$16 sps:$4 sm:$0xff]  }
  0x56   :  { %1892 = vmatpush1.bf16.msra.mxu0 %v3645_v47  ;;  %1852 = vmatprep.subr.bf16.mxu1 %v3646_v49  ;;  %v184_v44 = vxor.u32 %v176_v41, %v168_v36  ;;  %v147_v47 = vadd.s32 2246822519, %v139_v38  ;;  %v3711_v36 = vld [vmem:[#allocation3 + $0xcc] ss:$16 sps:$4 sm:$0xff]   ;;  %v3688_v38 = vld [vmem:[#allocation3 + $0x460] ss:$16 sps:$4 sm:$0xff]  }
  0x57   :  { %1893 = vmatprep.subr.bf16.mxu0 %v3648_v50  ;;  %v3681_v50 = vld [vmem:[#allocation3 + $0x2c] ss:$16 sps:$4 sm:$0xff]  }
  0x58   :  { %v192_v49 = vadd.s32 2246822519, %v184_v44  ;;  %v155_v57 = vshll.u32 %v147_v47, 8  ;;  %v3696_v44 = vld [vmem:[#allocation3 + $0x484] ss:$16 sps:$4 sm:$0xff]  }
  0x59   :  { %1853 = vmatpush1.bf16.msra.mxu1 %v3650_v55  ;;  %v100_v55 = vor.u32 %v4253_v4, %v91_v45  ;;  %v3717_v45 = vld [vmem:[#allocation3 + $0xec] ss:$16 sps:$4 sm:$0xff]  }
  0x5a   :  { %1894 = vmatpush1.bf16.msra.mxu0 %v3651_v59  ;;  %1854 = vmatprep.subr.bf16.mxu1 %v3652_v60  ;;  %v200_v54 = vshll.u32 %v192_v49, 2  ;;  %v3687_v60 = vld [vmem:[#allocation3 + $0x4c] ss:$16 sps:$4 sm:$0xff]   ;;  %v163_v6 = vxor.u32 %v155_v57, %v147_v47 }
  0x5b   :  { %1895 = vmatprep.subr.bf16.mxu0 %v3654_v62  ;;  %v248_v62 = vmul.f32 2.0, %v75_v53  ;;  %v109_v63 = vxor.u32 %v4258_v5, %v100_v55  ;;  %v78_v47 = vld [vmem:[%s4555_s1 + $0x28] sm:$0xff]  ;;  %v3702_v53 = vld [vmem:[#allocation3 + $0x4a4] ss:$16 sps:$4 sm:$0xff]  }
  0x5c   :  { %v208_v59 = vxor.u32 %v200_v54, %v192_v49  ;;  %v171_v14 = vadd.s32 2654435769, %v163_v6  ;;  %v3715_v54 = vld [vmem:[#allocation3 + $0xe8] ss:$16 sps:$4 sm:$0xff]   ;;  %v3723_v55 = vld [vmem:[#allocation3 + $0x10c] ss:$16 sps:$4 sm:$0xff]  }
  0x5d   :  { %1855 = vmatpush1.bf16.msra.mxu1 %v3656_v10  ;;  %v3670_v10 = vld [vmem:[#allocation3 + $0x400] ss:$16 sps:$4 sm:$0xff]   ;;  %v4329_v51 = vpack.c.bf16 %v248_v62, %v248_v62  ;;  %v3708_v62 = vld [vmem:[#allocation3 + $0x4c4] ss:$16 sps:$4 sm:$0xff]  }
  0x5e   :  { %1896 = vmatpush1.bf16.msra.mxu0 %v3657_v11  ;;  %1856 = vmatprep.subr.bf16.mxu1 %v3658_v13  ;;  %v216_v61 = vadd.s32 2654435769, %v208_v59  ;;  %v117_v13 = vadd.s32 305419889, %v109_v63  ;;  %v179_v20 = vshll.u32 %v171_v14, 4 }
  0x5f   :  { %1897 = vmatprep.subr.bf16.mxu0 %v3660_v15  ;;  %v122_v15 = vadd.s32 2654435769, %v114_v7  ;;  %v3700_v59 = vld [vmem:[#allocation3 + $0x4a0] ss:$16 sps:$4 sm:$0xff]   ;;  %v3721_v63 = vld [vmem:[#allocation3 + $0x108] ss:$16 sps:$4 sm:$0xff]  }
  0x60   :  { %v224_v8 = vshll.u32 %v216_v61, 1 }
  0x61   :  { %1857 = vmatpush1.bf16.msra.mxu1 %v3662_v19  ;;  %v3676_v19 = vld [vmem:[#allocation3 + $0x420] ss:$16 sps:$4 sm:$0xff]   ;;  %v130_v25 = vshll.u32 %v122_v15, 16 }
  0x62   :  { %1898 = vmatpush1.bf16.msra.mxu0 %v3663_v24  ;;  %1858 = vmatprep.subr.bf16.mxu1 %v3664_v26  ;;  %v232_v11 = vxor.u32 %v224_v8, %v216_v61  ;;  %v187_v24 = vxor.u32 %v179_v20, %v171_v14  ;;  %v125_v26 = vadd.s32 2654435769, %v117_v13  ;;  %v3735_v13 = vld [vmem:[#allocation3 + $0x14c] ss:$16 sps:$4 sm:$0xff]   ;;  %v3712_v14 = vld [vmem:[#allocation3 + $0x4e0] ss:$16 sps:$4 sm:$0xff]  }
  0x63   :  { %1899 = vmatprep.subr.bf16.mxu0 %v3666_v28  ;;  %v3705_v28 = vld [vmem:[#allocation3 + $0xac] ss:$16 sps:$4 sm:$0xff]   ;;  %v3720_v20 = vld [vmem:[#allocation3 + $0x504] ss:$16 sps:$4 sm:$0xff]   ;;  %v3958_v8 = vld [vmem:[#allocation6] ss:$8 sps:$4 sm:$0xff]  }
  0x64   :  { %vm240_vm6 = vcmp.ge.s32.totalorder %v232_v11, 0  ;;  %v195_v31 = vadd.s32 2246822519, %v187_v24  ;;  %v3718_v24 = vld [vmem:[#allocation3 + $0x500] ss:$16 sps:$4 sm:$0xff]  }
  0x65   :  { %1859 = vmatpush1.bf16.msra.mxu1 %v3668_v33  ;;  %vm4331_vm7 = vmpackc.low %vm240_vm6, %vm240_vm6  ;;  %v138_v33 = vxor.u32 %v130_v25, %v122_v15  ;;  %v3733_v15 = vld [vmem:[#allocation3 + $0x148] ss:$16 sps:$4 sm:$0xff]  }
  0x66   :  { %1900 = vmatpush1.bf16.msra.mxu0 %v3669_v34  ;;  %1992 = vmatprep.subr.bf16.mxu1 %v3675_v40  ;;  %v133_v34 = vshll.u32 %v125_v26, 16  ;;  %v3709_v40 = vld [vmem:[#allocation3 + $0xc8] ss:$16 sps:$4 sm:$0xff]  }
  0x67   :  { %1910 = vmatprep.subr.bf16.mxu0 %v3672_v37  ;;  %v203_v37 = vshll.u32 %v195_v31, 2  ;;  %v146_v41 = vadd.s32 2246822519, %v138_v33  ;;  %v3739_v25 = vld [vmem:[#allocation3 + $0x168] ss:$16 sps:$4 sm:$0xff]  }
  0x68   :  { %3370 = vmatmul.mubr.msk.bf16.vlgmr.msra.gmra.mrb[0].mxu1 %vm4312_vm5, %v4309_v42 }
  0x69   :  { %1993 = vmatpush1.bf16.msra.mxu1 %v3673_v43  ;;  %3391 = vmatprep.mubr.msk.bf16.mxu1 %vm4283_vm1, %v4287_v52  ;;  %v3678_v52 = vld [vmem:[#allocation3 + $0x424] ss:$16 sps:$4 sm:$0xff]   ;;  %v211_v39 = vxor.u32 %v203_v37, %v195_v31  ;;  %v141_v43 = vxor.u32 %v133_v34, %v125_v26  ;;  %v154_v57 = vshll.u32 %v146_v41, 8  ;;  %v3724_v31 = vld [vmem:[#allocation3 + $0x520] ss:$16 sps:$4 sm:$0xff]  }
  0x6a   :  { %1994 = vmatprep.subr.bf16.mxu1 %v3681_v50  ;;  %3376 = vmatmul.mubr.msk.bf16.vlgmr.msra.gmra.mrb[0].mxu0 %vm4331_vm7, %v4329_v51  ;;  %v251_v50 = vmul.f32 2.0, %v78_v47  ;;  %v3730_v37 = vld [vmem:[#allocation3 + $0x540] ss:$16 sps:$4 sm:$0xff]  }
  0x6b   :  { %1911 = vmatpush1.bf16.msra.mxu0 %v3670_v10  ;;  %v219_v49 = vadd.s32 2654435769, %v211_v39  ;;  %v149_v58 = vadd.s32 2246822519, %v141_v43  ;;  %v162_v6 = vxor.u32 %v154_v57, %v146_v41  ;;  %v3727_v10 = vld [vmem:[#allocation3 + $0x128] ss:$16 sps:$4 sm:$0xff]  }
  0x6c   :  { %1912 = vmatprep.subr.bf16.mxu0 %v3678_v52  ;;  %v4341_v61 = vpack.c.bf16 %v251_v50, %v251_v50  ;;  %v3738_v41 = vld [vmem:[#allocation3 + $0x564] ss:$16 sps:$4 sm:$0xff]   ;;  %v3759_v43 = vld [vmem:[#allocation3 + $0x1cc] ss:$16 sps:$4 sm:$0xff]  }
  0x6d   :  { %1995 = vmatpush1.bf16.msra.mxu1 %v3679_v56  ;;  %v227_v56 = vshll.u32 %v219_v49, 1  ;;  %v157_v7 = vshll.u32 %v149_v58, 8  ;;  %v170_v11 = vadd.s32 2654435769, %v162_v6  ;;  %v3765_v50 = vld [vmem:[#allocation3 + $0x1ec] ss:$16 sps:$4 sm:$0xff]  }
  0x6e   :  { %1996 = vmatprep.subr.bf16.mxu1 %v3687_v60 }
  0x6f   :  { %1913 = vmatpush1.bf16.msra.mxu0 %v3676_v19  ;;  %v235_v60 = vxor.u32 %v227_v56, %v219_v49  ;;  %v165_v52 = vxor.u32 %v157_v7, %v149_v58  ;;  %v3744_v49 = vld [vmem:[#allocation3 + $0x584] ss:$16 sps:$4 sm:$0xff]  }
  0x70   :  { %1914 = vmatprep.subr.bf16.mxu0 %v3684_v27  ;;  %v3750_v58 = vld [vmem:[#allocation3 + $0x5a4] ss:$16 sps:$4 sm:$0xff]  }
  0x71   :  { %1997 = vmatpush1.bf16.msra.mxu1 %v3685_v0  ;;  %v3729_v0 = vld [vmem:[#allocation3 + $0x12c] ss:$16 sps:$4 sm:$0xff]   ;;  %vm243_vm8 = vcmp.ge.s32.totalorder %v235_v60, 0  ;;  %v173_v19 = vadd.s32 2654435769, %v165_v52  ;;  %v77_v52 = vld [vmem:[%s4555_s1 + $0x20] sm:$0xff] }
  0x72   :  { %1998 = vmatprep.subr.bf16.mxu1 %v3693_v9  ;;  %vm4343_vm9 = vmpackc.low %vm243_vm8, %vm243_vm8  ;;  %v3706_v9 = vld [vmem:[#allocation3 + $0x4c0] ss:$16 sps:$4 sm:$0xff]   ;;  %v3756_v7 = vld [vmem:[#allocation3 + $0x5c4] ss:$16 sps:$4 sm:$0xff]  }
  0x73   :  { %1915 = vmatpush1.bf16.msra.mxu0 %v3682_v29  ;;  %3379 = vmatprep.mubr.msk.bf16.mxu0 %vm4343_vm9, %v4341_v61  ;;  %v181_v27 = vshll.u32 %v173_v19, 4  ;;  %v3747_v29 = vld [vmem:[#allocation3 + $0x18c] ss:$16 sps:$4 sm:$0xff]   ;;  %v3748_v60 = vld [vmem:[#allocation3 + $0x5a0] ss:$16 sps:$4 sm:$0xff]  }
  0x74   :  { %1916 = vmatprep.subr.bf16.mxu0 %v3690_v35  ;;  %v3732_v35 = vld [vmem:[#allocation3 + $0x544] ss:$16 sps:$4 sm:$0xff]  }
  0x75   :  { %1999 = vmatpush1.bf16.msra.mxu1 %v3691_v12  ;;  %v3714_v12 = vld [vmem:[#allocation3 + $0x4e4] ss:$16 sps:$4 sm:$0xff]   ;;  %v189_v34 = vxor.u32 %v181_v27, %v173_v19 }
  0x76   :  { %2000 = vmatprep.subr.bf16.mxu1 %v3699_v16  ;;  %v178_v16 = vshll.u32 %v170_v11, 4 }
  0x77   :  { %1917 = vmatpush1.bf16.msra.mxu0 %v3688_v38  ;;  %v3751_v38 = vld [vmem:[#allocation3 + $0x1a8] ss:$16 sps:$4 sm:$0xff]  }
  0x78   :  { %1918 = vmatprep.subr.bf16.mxu0 %v3696_v44  ;;  %v186_v26 = vxor.u32 %v178_v16, %v170_v11  ;;  %v3736_v44 = vld [vmem:[#allocation3 + $0x560] ss:$16 sps:$4 sm:$0xff]  }
  0x79   :  { %2001 = vmatpush1.bf16.msra.mxu1 %v3697_v23  ;;  %v3741_v23 = vld [vmem:[#allocation3 + $0x16c] ss:$16 sps:$4 sm:$0xff]   ;;  %v3760_v16 = vld [vmem:[#allocation3 + $0x5e0] ss:$16 sps:$4 sm:$0xff]  }
  0x7a   :  { %2002 = vmatprep.subr.bf16.mxu1 %v3705_v28  ;;  %v3726_v28 = vld [vmem:[#allocation3 + $0x524] ss:$16 sps:$4 sm:$0xff]   ;;  %v194_v33 = vadd.s32 2246822519, %v186_v26  ;;  %v3766_v26 = vld [vmem:[#allocation3 + $0x600] ss:$16 sps:$4 sm:$0xff]  }
  0x7b   :  { %1919 = vmatpush1.bf16.msra.mxu0 %v3694_v48 }
  0x7c   :  { %1920 = vmatprep.subr.bf16.mxu0 %v3702_v53  ;;  %v202_v39 = vshll.u32 %v194_v33, 2  ;;  %v90_v53 = vadd.s32 768, %v4247_v2 }
  0x7d   :  { %2003 = vmatpush1.bf16.msra.mxu1 %v3703_v32  ;;  %v3745_v32 = vld [vmem:[#allocation3 + $0x188] ss:$16 sps:$4 sm:$0xff]  }
  0x7e   :  { %2004 = vmatprep.subr.bf16.mxu1 %v3711_v36  ;;  %v3753_v36 = vld [vmem:[#allocation3 + $0x1ac] ss:$16 sps:$4 sm:$0xff]   ;;  %v210_v47 = vxor.u32 %v202_v39, %v194_v33  ;;  %v3772_v33 = vld [vmem:[#allocation3 + $0x620] ss:$16 sps:$4 sm:$0xff]  }
  0x7f   :  { %1921 = vmatpush1.bf16.msra.mxu0 %v3700_v59  ;;  %v3771_v59 = vld [vmem:[#allocation3 + $0x20c] ss:$16 sps:$4 sm:$0xff]  }
  0x80   :  { %1922 = vmatprep.subr.bf16.mxu0 %v3708_v62  ;;  %v218_v56 = vadd.s32 2654435769, %v210_v47  ;;  %v99_v62 = vor.u32 %v4253_v4, %v90_v53  ;;  %v3801_v39 = vld [vmem:[#allocation3 + $0x2ac] ss:$16 sps:$4 sm:$0xff]   ;;  %v3784_v47 = vld [vmem:[#allocation3 + $0x660] ss:$16 sps:$4 sm:$0xff]  }
  0x81   :  { %2005 = vmatpush1.bf16.msra.mxu1 %v3709_v40  ;;  %v197_v40 = vadd.s32 2246822519, %v189_v34  ;;  %v3813_v53 = vld [vmem:[#allocation3 + $0x2ec] ss:$16 sps:$4 sm:$0xff]  }
  0x82   :  { %2006 = vmatprep.subr.bf16.mxu1 %v3717_v45  ;;  %v3757_v45 = vld [vmem:[#allocation3 + $0x1c8] ss:$16 sps:$4 sm:$0xff]   ;;  %v108_v11 = vxor.u32 %v4258_v5, %v99_v62 }
  0x83   :  { %1923 = vmatpush1.bf16.msra.mxu0 %v3706_v9  ;;  %v205_v48 = vshll.u32 %v197_v40, 2  ;;  %v3777_v9 = vld [vmem:[#allocation3 + $0x22c] ss:$16 sps:$4 sm:$0xff]   ;;  %v3817_v62 = vld [vmem:[#allocation3 + $0x308] ss:$16 sps:$4 sm:$0xff]  }
  0x84   :  { %1924 = vmatprep.subr.bf16.mxu0 %v3714_v12  ;;  %v3775_v12 = vld [vmem:[#allocation3 + $0x228] ss:$16 sps:$4 sm:$0xff]   ;;  %v116_v19 = vadd.s32 305419889, %v108_v11  ;;  %v3831_v11 = vld [vmem:[#allocation3 + $0x34c] ss:$16 sps:$4 sm:$0xff]  }
  0x85   :  { %2007 = vmatpush1.bf16.msra.mxu1 %v3715_v54  ;;  %v3742_v54 = vld [vmem:[#allocation3 + $0x580] ss:$16 sps:$4 sm:$0xff]   ;;  %v213_v57 = vxor.u32 %v205_v48, %v197_v40 }
  0x86   :  { %2008 = vmatprep.subr.bf16.mxu1 %v3723_v55  ;;  %v3763_v55 = vld [vmem:[#allocation3 + $0x1e8] ss:$16 sps:$4 sm:$0xff]   ;;  %v124_v30 = vadd.s32 2654435769, %v116_v19  ;;  %v3778_v40 = vld [vmem:[#allocation3 + $0x640] ss:$16 sps:$4 sm:$0xff]  }
  0x87   :  { %1925 = vmatpush1.bf16.msra.mxu0 %v3712_v14  ;;  %v221_v6 = vadd.s32 2654435769, %v213_v57  ;;  %v3762_v14 = vld [vmem:[#allocation3 + $0x5e4] ss:$16 sps:$4 sm:$0xff]  }
  0x88   :  { %1926 = vmatprep.subr.bf16.mxu0 %v3720_v20  ;;  %v3768_v20 = vld [vmem:[#allocation3 + $0x604] ss:$16 sps:$4 sm:$0xff]  }
  0x89   :  { %2009 = vmatpush1.bf16.msra.mxu1 %v3721_v63  ;;  %v3769_v63 = vld [vmem:[#allocation3 + $0x208] ss:$16 sps:$4 sm:$0xff]   ;;  %v3798_v57 = vld [vmem:[#allocation3 + $0x6a4] ss:$16 sps:$4 sm:$0xff]  }
  0x8a   :  { %2010 = vmatprep.subr.bf16.mxu1 %v3729_v0  ;;  %v226_v0 = vshll.u32 %v218_v56, 1 }
  0x8b   :  { %1927 = vmatpush1.bf16.msra.mxu0 %v3718_v24 }
  0x8c   :  { %1928 = vmatprep.subr.bf16.mxu0 %v3726_v28  ;;  %v234_v4 = vxor.u32 %v226_v0, %v218_v56  ;;  %v3811_v56 = vld [vmem:[#allocation3 + $0x2e8] ss:$16 sps:$4 sm:$0xff]   ;;  %v3825_v0 = vld [vmem:[#allocation3 + $0x32c] ss:$16 sps:$4 sm:$0xff]  }
  0x8d   :  { %2011 = vmatpush1.bf16.msra.mxu1 %v3727_v10  ;;  %v3754_v10 = vld [vmem:[#allocation3 + $0x5c0] ss:$16 sps:$4 sm:$0xff]   ;;  %v3922_v28 = vld [vmem:[#allocation3 + $0x688] ss:$16 sps:$4 sm:$0xff]  }
  0x8e   :  { %2012 = vmatprep.subr.bf16.mxu1 %v3735_v13  ;;  %v229_v13 = vshll.u32 %v221_v6, 1  ;;  %vm242_vm10 = vcmp.ge.s32.totalorder %v234_v4, 0  ;;  %v3808_v4 = vld [vmem:[#allocation3 + $0x6e0] ss:$16 sps:$4 sm:$0xff]  }
  0x8f   :  { %1929 = vmatpush1.bf16.msra.mxu0 %v3724_v31  ;;  %vm4365_vm11 = vmpackc.low %vm242_vm10, %vm242_vm10  ;;  %v3774_v31 = vld [vmem:[#allocation3 + $0x624] ss:$16 sps:$4 sm:$0xff]  }
  0x90   :  { %1930 = vmatprep.subr.bf16.mxu0 %v3732_v35  ;;  %v237_v24 = vxor.u32 %v229_v13, %v221_v6  ;;  %v3816_v13 = vld [vmem:[#allocation3 + $0x704] ss:$16 sps:$4 sm:$0xff]   ;;  %v3930_v35 = vld [vmem:[#allocation3 + $0x6cc] ss:$16 sps:$4 sm:$0xff]  }
  0x91   :  { %2013 = vmatpush1.bf16.msra.mxu1 %v3733_v15  ;;  %v3783_v15 = vld [vmem:[#allocation3 + $0x24c] ss:$16 sps:$4 sm:$0xff]  }
  0x92   :  { %2014 = vmatprep.subr.bf16.mxu1 %v3741_v23  ;;  %v250_v23 = vmul.f32 2.0, %v77_v52  ;;  %vm245_vm12 = vcmp.ge.s32.totalorder %v237_v24, 0 }
  0x93   :  { %1931 = vmatpush1.bf16.msra.mxu0 %v3730_v37  ;;  %vm4376_vm13 = vmpackc.low %vm245_vm12, %vm245_vm12  ;;  %v3793_v37 = vld [vmem:[#allocation3 + $0x288] ss:$16 sps:$4 sm:$0xff]  }
  0x94   :  { %1932 = vmatprep.subr.bf16.mxu0 %v3738_v41 }
  0x95   :  { %2015 = vmatpush1.bf16.msra.mxu1 %v3739_v25  ;;  %v3789_v25 = vld [vmem:[#allocation3 + $0x26c] ss:$16 sps:$4 sm:$0xff]  }
  0x96   :  { %2016 = vmatprep.subr.bf16.mxu1 %v3747_v29  ;;  %v3787_v29 = vld [vmem:[#allocation3 + $0x268] ss:$16 sps:$4 sm:$0xff]  }
  0x97   :  { %1933 = vmatpush1.bf16.msra.mxu0 %v3736_v44  ;;  %v3786_v44 = vld [vmem:[#allocation3 + $0x664] ss:$16 sps:$4 sm:$0xff]  }
  0x98   :  { %1934 = vmatprep.subr.bf16.mxu0 %v3744_v49  ;;  %v3805_v49 = vld [vmem:[#allocation3 + $0x2c8] ss:$16 sps:$4 sm:$0xff]  }
  0x99   :  { %2017 = vmatpush1.bf16.msra.mxu1 %v3745_v32  ;;  %v3795_v32 = vld [vmem:[#allocation3 + $0x28c] ss:$16 sps:$4 sm:$0xff]  }
  0x9a   :  { %2018 = vmatprep.subr.bf16.mxu1 %v3753_v36  ;;  %v132_v36 = vshll.u32 %v124_v30, 16 }
  0x9b   :  { %1935 = vmatpush1.bf16.msra.mxu0 %v3742_v54  ;;  %v3790_v54 = vld [vmem:[#allocation3 + $0x680] ss:$16 sps:$4 sm:$0xff]  }
  0x9c   :  { %1936 = vmatprep.subr.bf16.mxu0 %v3750_v58  ;;  %v140_v41 = vxor.u32 %v132_v36, %v124_v30  ;;  %v3819_v58 = vld [vmem:[#allocation3 + $0x30c] ss:$16 sps:$4 sm:$0xff]   ;;  %v3834_v30 = vld [vmem:[#allocation3 + $0x764] ss:$16 sps:$4 sm:$0xff]  }
  0x9d   :  { %2019 = vmatpush1.bf16.msra.mxu1 %v3751_v38  ;;  %v3780_v38 = vld [vmem:[#allocation3 + $0x644] ss:$16 sps:$4 sm:$0xff]  }
  0x9e   :  { %2020 = vmatprep.subr.bf16.mxu1 %v3759_v43  ;;  %v3799_v43 = vld [vmem:[#allocation3 + $0x2a8] ss:$16 sps:$4 sm:$0xff]   ;;  %v148_v48 = vadd.s32 2246822519, %v140_v41  ;;  %v3840_v36 = vld [vmem:[#allocation3 + $0x784] ss:$16 sps:$4 sm:$0xff]  }
  0x9f   :  { %1937 = vmatpush1.bf16.msra.mxu0 %v3748_v60  ;;  %v3846_v41 = vld [vmem:[#allocation3 + $0x7a4] ss:$16 sps:$4 sm:$0xff]  }
  0xa0   :  { %1938 = vmatprep.subr.bf16.mxu0 %v3756_v7  ;;  %v3802_v7 = vld [vmem:[#allocation3 + $0x6c0] ss:$16 sps:$4 sm:$0xff]  }
  0xa1   :  { %2021 = vmatpush1.bf16.msra.mxu1 %v3757_v45  ;;  %v3807_v45 = vld [vmem:[#allocation3 + $0x2cc] ss:$16 sps:$4 sm:$0xff]  }
  0xa2   :  { %2022 = vmatprep.subr.bf16.mxu1 %v3765_v50  ;;  %v3792_v50 = vld [vmem:[#allocation3 + $0x684] ss:$16 sps:$4 sm:$0xff]  }
  0xa3   :  { %1939 = vmatpush1.bf16.msra.mxu0 %v3754_v10  ;;  %v3810_v10 = vld [vmem:[#allocation3 + $0x6e4] ss:$16 sps:$4 sm:$0xff]  }
  0xa4   :  { %1940 = vmatprep.subr.bf16.mxu0 %v3762_v14  ;;  %v3837_v14 = vld [vmem:[#allocation3 + $0x36c] ss:$16 sps:$4 sm:$0xff]  }
  0xa5   :  { %2023 = vmatpush1.bf16.msra.mxu1 %v3763_v55  ;;  %v156_v55 = vshll.u32 %v148_v48, 8 }
  0xa6   :  { %2033 = vmatprep.subr.bf16.mxu1 %v3771_v59  ;;  %v3796_v59 = vld [vmem:[#allocation3 + $0x6a0] ss:$16 sps:$4 sm:$0xff]  }
  0xa7   :  { %1941 = vmatpush1.bf16.msra.mxu0 %v3760_v16  ;;  %v164_v60 = vxor.u32 %v156_v55, %v148_v48  ;;  %v3822_v16 = vld [vmem:[#allocation3 + $0x724] ss:$16 sps:$4 sm:$0xff]   ;;  %v3862_v48 = vld [vmem:[#allocation3 + $0x408] ss:$16 sps:$4 sm:$0xff]   ;;  %v3850_v55 = vld [vmem:[#allocation3 + $0x7c0] ss:$16 sps:$4 sm:$0xff]  }
  0xa8   :  { %3394 = vmatmul.mubr.msk.bf16.vlgmr.msra.gmra.mrb[4].mxu1 %vm4312_vm5, %v4309_v42  ;;  %v80_v42 = vld [vmem:[%s4555_s1 + $0x38] sm:$0xff]  ;;  %1951 = vmatprep.subr.bf16.mxu0 %v3768_v20 }
  0xa9   :  { %2034 = vmatpush1.bf16.msra.mxu1 %v3769_v63  ;;  %3397 = vmatprep.mubr.msk.bf16.mxu1 %vm4301_vm3, %v4296_v22  ;;  %v253_v27 = vmul.f32 2.0, %v80_v42  ;;  %v4369_v22 = vpack.c.bf16 %v250_v23, %v250_v23  ;;  %v3804_v63 = vld [vmem:[#allocation3 + $0x6c4] ss:$16 sps:$4 sm:$0xff]   ;;  %v172_v6 = vadd.s32 2654435769, %v164_v60 }
  0xaa   :  { %2035 = vmatprep.subr.bf16.mxu1 %v3777_v9  ;;  %v3823_v9 = vld [vmem:[#allocation3 + $0x328] ss:$16 sps:$4 sm:$0xff]   ;;  %v3843_v23 = vld [vmem:[#allocation3 + $0x38c] ss:$16 sps:$4 sm:$0xff]   ;;  %v3820_v42 = vld [vmem:[#allocation3 + $0x720] ss:$16 sps:$4 sm:$0xff]  }
  0xab   :  { %v4371_v34 = vpack.c.bf16 %v253_v27, %v253_v27  ;;  %3382 = vmatmul.mubr.msk.bf16.vlgmr.msra.gmra.mrb[0].mxu0 %vm4365_vm11, %v4369_v22  ;;  %v180_v52 = vshll.u32 %v172_v6, 4  ;;  %v3835_v20 = vld [vmem:[#allocation3 + $0x368] ss:$16 sps:$4 sm:$0xff]   ;;  %v3826_v27 = vld [vmem:[#allocation3 + $0x740] ss:$16 sps:$4 sm:$0xff]  }
  0xac   :  { %1952 = vmatpush1.bf16.msra.mxu0 %v3766_v26  ;;  %v3849_v26 = vld [vmem:[#allocation3 + $0x3ac] ss:$16 sps:$4 sm:$0xff]  }
  0xad   :  { %2036 = vmatpush1.bf16.msra.mxu1 %v3775_v12  ;;  %1953 = vmatprep.subr.bf16.mxu0 %v3774_v31  ;;  %v3829_v12 = vld [vmem:[#allocation3 + $0x348] ss:$16 sps:$4 sm:$0xff]   ;;  %v188_v19 = vxor.u32 %v180_v52, %v172_v6  ;;  %v3879_v52 = vld [vmem:[#allocation3 + $0x4ac] ss:$16 sps:$4 sm:$0xff]  }
  0xae   :  { %2037 = vmatprep.subr.bf16.mxu1 %v3783_v15  ;;  %3385 = vmatprep.mubr.msk.bf16.mxu0 %vm4376_vm13, %v4371_v34  ;;  %v3814_v15 = vld [vmem:[#allocation3 + $0x700] ss:$16 sps:$4 sm:$0xff]   ;;  %v3847_v31 = vld [vmem:[#allocation3 + $0x3a8] ss:$16 sps:$4 sm:$0xff]  }
  0xaf   :  { %v196_v24 = vadd.s32 2246822519, %v188_v19  ;;  %v3967_v19 = vld [vmem:[#allocation6 + $0x30] ss:$8 sps:$4 sm:$0xff]  }
  0xb0   :  { %1954 = vmatpush1.bf16.msra.mxu0 %v3772_v33  ;;  %v3832_v33 = vld [vmem:[#allocation3 + $0x760] ss:$16 sps:$4 sm:$0xff]  }
  0xb1   :  { %2038 = vmatpush1.bf16.msra.mxu1 %v3781_v46  ;;  %1955 = vmatprep.subr.bf16.mxu0 %v3780_v38  ;;  %v3828_v46 = vld [vmem:[#allocation3 + $0x744] ss:$16 sps:$4 sm:$0xff]   ;;  %v3853_v38 = vld [vmem:[#allocation3 + $0x3c8] ss:$16 sps:$4 sm:$0xff]  }
  0xb2   :  { %2039 = vmatprep.subr.bf16.mxu1 %v3789_v25  ;;  %v3841_v25 = vld [vmem:[#allocation3 + $0x388] ss:$16 sps:$4 sm:$0xff]  }
  0xb4   :  { %1956 = vmatpush1.bf16.msra.mxu0 %v3778_v40  ;;  %v3838_v40 = vld [vmem:[#allocation3 + $0x780] ss:$16 sps:$4 sm:$0xff]  }
  0xb5   :  { %2040 = vmatpush1.bf16.msra.mxu1 %v3787_v29  ;;  %1957 = vmatprep.subr.bf16.mxu0 %v3786_v44  ;;  %v204_v29 = vshll.u32 %v196_v24, 2  ;;  %v3859_v44 = vld [vmem:[#allocation3 + $0x3e8] ss:$16 sps:$4 sm:$0xff]  }
  0xb6   :  { %2041 = vmatprep.subr.bf16.mxu1 %v3795_v32  ;;  %v3855_v32 = vld [vmem:[#allocation3 + $0x3cc] ss:$16 sps:$4 sm:$0xff]  }
  0xb8   :  { %1958 = vmatpush1.bf16.msra.mxu0 %v3784_v47  ;;  %v3844_v47 = vld [vmem:[#allocation3 + $0x7a0] ss:$16 sps:$4 sm:$0xff]  }
  0xb9   :  { %2042 = vmatpush1.bf16.msra.mxu1 %v3793_v37  ;;  %1959 = vmatprep.subr.bf16.mxu0 %v3792_v50  ;;  %v212_v37 = vxor.u32 %v204_v29, %v196_v24  ;;  %v3888_v24 = vld [vmem:[#allocation3 + $0x50c] ss:$16 sps:$4 sm:$0xff]  }
  0xba   :  { %2043 = vmatprep.subr.bf16.mxu1 %v3801_v39  ;;  %v3861_v39 = vld [vmem:[#allocation3 + $0x3ec] ss:$16 sps:$4 sm:$0xff]  }
  0xbb   :  { %v3978_v29 = vld [vmem:[#allocation6 + $0x64] ss:$8 sps:$4 sm:$0xff]  }
  0xbc   :  { %1960 = vmatpush1.bf16.msra.mxu0 %v3790_v54 }
  0xbd   :  { %2044 = vmatpush1.bf16.msra.mxu1 %v3799_v43  ;;  %1961 = vmatprep.subr.bf16.mxu0 %v3798_v57  ;;  %v220_v43 = vadd.s32 2654435769, %v212_v37  ;;  %v3865_v57 = vld [vmem:[#allocation3 + $0x428] ss:$16 sps:$4 sm:$0xff]  }
  0xbe   :  { %2045 = vmatprep.subr.bf16.mxu1 %v3807_v45  ;;  %v3864_v45 = vld [vmem:[#allocation3 + $0x40c] ss:$16 sps:$4 sm:$0xff]   ;;  %v3892_v37 = vld [vmem:[#allocation3 + $0x548] ss:$16 sps:$4 sm:$0xff]  }
  0xbf   :  { %v228_v50 = vshll.u32 %v220_v43, 1 }
  0xc0   :  { %1962 = vmatpush1.bf16.msra.mxu0 %v3796_v59  ;;  %v3870_v59 = vld [vmem:[#allocation3 + $0x44c] ss:$16 sps:$4 sm:$0xff]  }
  0xc1   :  { %2046 = vmatpush1.bf16.msra.mxu1 %v3805_v49  ;;  %1963 = vmatprep.subr.bf16.mxu0 %v3804_v63  ;;  %v3852_v49 = vld [vmem:[#allocation3 + $0x7c4] ss:$16 sps:$4 sm:$0xff]   ;;  %v236_v54 = vxor.u32 %v228_v50, %v220_v43  ;;  %v3982_v43 = vld [vmem:[#allocation6 + $0x80] ss:$8 sps:$4 sm:$0xff]  }
  0xc2   :  { %2047 = vmatprep.subr.bf16.mxu1 %v3813_v53  ;;  %v3867_v53 = vld [vmem:[#allocation3 + $0x42c] ss:$16 sps:$4 sm:$0xff]  }
  0xc3   :  { %vm244_vm14 = vcmp.ge.s32.totalorder %v236_v54, 0  ;;  %v3960_v63 = vld [vmem:[#allocation6 + $0x4] ss:$8 sps:$4 sm:$0xff]   ;;  %v3988_v54 = vld [vmem:[#allocation6 + $0xa0] ss:$8 sps:$4 sm:$0xff]  }
  0xc4   :  { %1964 = vmatpush1.bf16.msra.mxu0 %v3802_v7  ;;  %vm4392_vm15 = vmpackc.low %vm244_vm14, %vm244_vm14  ;;  %v3871_v7 = vld [vmem:[#allocation3 + $0x468] ss:$16 sps:$4 sm:$0xff]   ;;  %v3990_v50 = vld [vmem:[#allocation6 + $0xa4] ss:$8 sps:$4 sm:$0xff]  }
  0xc5   :  { %2048 = vmatpush1.bf16.msra.mxu1 %v3811_v56  ;;  %1965 = vmatprep.subr.bf16.mxu0 %v3810_v10  ;;  %v79_v56 = vld [vmem:[%s4555_s1 + $0x30] sm:$0xff]  ;;  %v3874_v10 = vld [vmem:[#allocation3 + $0x488] ss:$16 sps:$4 sm:$0xff]  }
  0xc6   :  { %2049 = vmatprep.subr.bf16.mxu1 %v3819_v58  ;;  %v3858_v58 = vld [vmem:[#allocation3 + $0x7e4] ss:$16 sps:$4 sm:$0xff]   ;;  %v252_v60 = vmul.f32 2.0, %v79_v56 }
  0xc7   :  { %v3993_v56 = vld [vmem:[#allocation6 + $0xb4] ss:$8 sps:$4 sm:$0xff]  }
  0xc8   :  { %1966 = vmatpush1.bf16.msra.mxu0 %v3808_v4  ;;  %v4396_v6 = vpack.c.bf16 %v252_v60, %v252_v60  ;;  %v3966_v4 = vld [vmem:[#allocation6 + $0x24] ss:$8 sps:$4 sm:$0xff]  }
  0xc9   :  { %2050 = vmatpush1.bf16.msra.mxu1 %v3817_v62  ;;  %1967 = vmatprep.subr.bf16.mxu0 %v3816_v13  ;;  %v3873_v62 = vld [vmem:[#allocation3 + $0x46c] ss:$16 sps:$4 sm:$0xff]   ;;  %v3964_v13 = vld [vmem:[#allocation6 + $0x20] ss:$8 sps:$4 sm:$0xff]  }
  0xca   :  { %2051 = vmatprep.subr.bf16.mxu1 %v3825_v0  ;;  %v3996_v60 = vld [vmem:[#allocation6 + $0xc4] ss:$8 sps:$4 sm:$0xff]  }
  0xcc   :  { %1968 = vmatpush1.bf16.msra.mxu0 %v3814_v15  ;;  %v3969_v15 = vld [vmem:[#allocation6 + $0x34] ss:$8 sps:$4 sm:$0xff]  }
  0xcd   :  { %2052 = vmatpush1.bf16.msra.mxu1 %v3823_v9  ;;  %1969 = vmatprep.subr.bf16.mxu0 %v3822_v16  ;;  %v3876_v9 = vld [vmem:[#allocation3 + $0x48c] ss:$16 sps:$4 sm:$0xff]   ;;  %v3880_v16 = vld [vmem:[#allocation3 + $0x4c8] ss:$16 sps:$4 sm:$0xff]  }
  0xce   :  { %2053 = vmatprep.subr.bf16.mxu1 %v3831_v11  ;;  %v3961_v11 = vld [vmem:[#allocation6 + $0x10] ss:$8 sps:$4 sm:$0xff]  }
  0xd0   :  { %1970 = vmatpush1.bf16.msra.mxu0 %v3820_v42  ;;  %v3883_v42 = vld [vmem:[#allocation3 + $0x4e8] ss:$16 sps:$4 sm:$0xff]  }
  0xd1   :  { %2054 = vmatpush1.bf16.msra.mxu1 %v3829_v12  ;;  %1971 = vmatprep.subr.bf16.mxu0 %v3828_v46  ;;  %v3877_v12 = vld [vmem:[#allocation3 + $0x4a8] ss:$16 sps:$4 sm:$0xff]  }
  0xd2   :  { %2055 = vmatprep.subr.bf16.mxu1 %v3837_v14  ;;  %v3882_v14 = vld [vmem:[#allocation3 + $0x4cc] ss:$16 sps:$4 sm:$0xff]   ;;  %v3970_v46 = vld [vmem:[#allocation6 + $0x40] ss:$8 sps:$4 sm:$0xff]  }
  0xd4   :  { %1972 = vmatpush1.bf16.msra.mxu0 %v3826_v27  ;;  %v3973_v27 = vld [vmem:[#allocation6 + $0x50] ss:$8 sps:$4 sm:$0xff]  }
  0xd5   :  { %2056 = vmatpush1.bf16.msra.mxu1 %v3835_v20  ;;  %1973 = vmatprep.subr.bf16.mxu0 %v3834_v30  ;;  %v3885_v20 = vld [vmem:[#allocation3 + $0x4ec] ss:$16 sps:$4 sm:$0xff]  }
  0xd6   :  { %2057 = vmatprep.subr.bf16.mxu1 %v3843_v23  ;;  %v3972_v23 = vld [vmem:[#allocation6 + $0x44] ss:$8 sps:$4 sm:$0xff]  }
  0xd7   :  { %v3891_v30 = vld [vmem:[#allocation3 + $0x52c] ss:$16 sps:$4 sm:$0xff]  }
  0xd8   :  { %1974 = vmatpush1.bf16.msra.mxu0 %v3832_v33  ;;  %v3894_v33 = vld [vmem:[#allocation3 + $0x54c] ss:$16 sps:$4 sm:$0xff]  }
  0xd9   :  { %2058 = vmatpush1.bf16.msra.mxu1 %v3841_v25  ;;  %1975 = vmatprep.subr.bf16.mxu0 %v3840_v36  ;;  %v3975_v25 = vld [vmem:[#allocation6 + $0x54] ss:$8 sps:$4 sm:$0xff]  }
  0xda   :  { %2059 = vmatprep.subr.bf16.mxu1 %v3849_v26  ;;  %v3886_v26 = vld [vmem:[#allocation3 + $0x508] ss:$16 sps:$4 sm:$0xff]   ;;  %v3981_v36 = vld [vmem:[#allocation6 + $0x74] ss:$8 sps:$4 sm:$0xff]  }
  0xdc   :  { %1976 = vmatpush1.bf16.msra.mxu0 %v3838_v40  ;;  %v3984_v40 = vld [vmem:[#allocation6 + $0x84] ss:$8 sps:$4 sm:$0xff]  }
  0xdd   :  { %2060 = vmatpush1.bf16.msra.mxu1 %v3847_v31  ;;  %1977 = vmatprep.subr.bf16.mxu0 %v3846_v41  ;;  %v3889_v31 = vld [vmem:[#allocation3 + $0x528] ss:$16 sps:$4 sm:$0xff]  }
  0xde   :  { %2061 = vmatprep.subr.bf16.mxu1 %v3855_v32  ;;  %v3976_v32 = vld [vmem:[#allocation6 + $0x60] ss:$8 sps:$4 sm:$0xff]  }
  0xdf   :  { %v3895_v41 = vld [vmem:[#allocation3 + $0x568] ss:$16 sps:$4 sm:$0xff]  }
  0xe0   :  { %1978 = vmatpush1.bf16.msra.mxu0 %v3844_v47  ;;  %v3898_v47 = vld [vmem:[#allocation3 + $0x588] ss:$16 sps:$4 sm:$0xff]  }
  0xe1   :  { %2062 = vmatpush1.bf16.msra.mxu1 %v3853_v38  ;;  %1979 = vmatprep.subr.bf16.mxu0 %v3852_v49  ;;  %v3979_v38 = vld [vmem:[#allocation6 + $0x70] ss:$8 sps:$4 sm:$0xff]   ;;  %v3903_v49 = vld [vmem:[#allocation3 + $0x5ac] ss:$16 sps:$4 sm:$0xff]  }
  0xe2   :  { %2063 = vmatprep.subr.bf16.mxu1 %v3861_v39  ;;  %v3897_v39 = vld [vmem:[#allocation3 + $0x56c] ss:$16 sps:$4 sm:$0xff]  }
  0xe4   :  { %1980 = vmatpush1.bf16.msra.mxu0 %v3850_v55  ;;  %v3906_v55 = vld [vmem:[#allocation3 + $0x5cc] ss:$16 sps:$4 sm:$0xff]  }
  0xe5   :  { %2064 = vmatpush1.bf16.msra.mxu1 %v3859_v44  ;;  %1981 = vmatprep.subr.bf16.mxu0 %v3858_v58  ;;  %v3900_v44 = vld [vmem:[#allocation3 + $0x58c] ss:$16 sps:$4 sm:$0xff]   ;;  %v3991_v58 = vld [vmem:[#allocation6 + $0xb0] ss:$8 sps:$4 sm:$0xff]  }
  0xe6   :  { %2074 = vmatprep.subr.bf16.mxu1 %v3864_v45  ;;  %v3987_v45 = vld [vmem:[#allocation6 + $0x94] ss:$8 sps:$4 sm:$0xff]  }
  0xe8   :  { %3400 = vmatmul.mubr.msk.bf16.vlgmr.msra.gmra.mrb[4].mxu1 %vm4331_vm7, %v4329_v51  ;;  %v3856_v51 = vld [vmem:[#allocation3 + $0x7e0] ss:$16 sps:$4 sm:$0xff]  }
  0xe9   :  { %2075 = vmatpush1.bf16.msra.mxu1 %v3862_v48  ;;  %3403 = vmatprep.mubr.msk.bf16.mxu1 %vm4343_vm9, %v4341_v61  ;;  %v3963_v61 = vld [vmem:[#allocation6 + $0x14] ss:$8 sps:$4 sm:$0xff]   ;;  %v3985_v48 = vld [vmem:[#allocation6 + $0x90] ss:$8 sps:$4 sm:$0xff]  }
  0xea   :  { %2076 = vmatprep.subr.bf16.mxu1 %v3867_v53  ;;  %1982 = vmatpush1.bf16.msra.mxu0 %v3856_v51  ;;  %v3901_v53 = vld [vmem:[#allocation3 + $0x5a8] ss:$16 sps:$4 sm:$0xff]  }
  0xeb   :  { %2645 = vmatprep.subr.bf16.mxu0 %v3960_v63  ;;  %v3907_v51 = vld [vmem:[#allocation3 + $0x5e8] ss:$16 sps:$4 sm:$0xff]   ;;  %v3999_v63 = vld [vmem:[#allocation6 + $0xd4] ss:$8 sps:$4 sm:$0xff]  }
  0xed   :  { %2077 = vmatpush1.bf16.msra.mxu1 %v3865_v57  ;;  %3388 = vmatmul.mubr.msk.bf16.vlgmr.msra.gmra.mrb[0].mxu0 %vm4392_vm15, %v4396_v6  ;;  %v3904_v57 = vld [vmem:[#allocation3 + $0x5c8] ss:$16 sps:$4 sm:$0xff]  }
  0xee   :  { %2078 = vmatprep.subr.bf16.mxu1 %v3870_v59  ;;  %2646 = vmatpush1.bf16.msra.mxu0 %v3958_v8  ;;  %v3909_v59 = vld [vmem:[#allocation3 + $0x5ec] ss:$16 sps:$4 sm:$0xff]   ;;  %v3997_v8 = vld [vmem:[#allocation6 + $0xd0] ss:$8 sps:$4 sm:$0xff]  }
  0xef   :  { %2647 = vmatprep.subr.bf16.mxu0 %v3963_v61  ;;  %v3913_v61 = vld [vmem:[#allocation3 + $0x628] ss:$16 sps:$4 sm:$0xff]  }
  0xf1   :  { %2079 = vmatpush1.bf16.msra.mxu1 %v3868_v17  ;;  %v3994_v17 = vld [vmem:[#allocation6 + $0xc0] ss:$8 sps:$4 sm:$0xff]  }
  0xf2   :  { %2080 = vmatprep.subr.bf16.mxu1 %v3873_v62  ;;  %2648 = vmatpush1.bf16.msra.mxu0 %v3961_v11  ;;  %v3912_v62 = vld [vmem:[#allocation3 + $0x60c] ss:$16 sps:$4 sm:$0xff]   ;;  %v3916_v11 = vld [vmem:[#allocation3 + $0x648] ss:$16 sps:$4 sm:$0xff]  }
  0xf3   :  { %2649 = vmatprep.subr.bf16.mxu0 %v3966_v4  ;;  %v3919_v4 = vld [vmem:[#allocation3 + $0x668] ss:$16 sps:$4 sm:$0xff]  }
  0xf5   :  { %2081 = vmatpush1.bf16.msra.mxu1 %v3871_v7  ;;  %v3910_v7 = vld [vmem:[#allocation3 + $0x608] ss:$16 sps:$4 sm:$0xff]  }
  0xf6   :  { %2082 = vmatprep.subr.bf16.mxu1 %v3876_v9  ;;  %2650 = vmatpush1.bf16.msra.mxu0 %v3964_v13  ;;  %v3915_v9 = vld [vmem:[#allocation3 + $0x62c] ss:$16 sps:$4 sm:$0xff]   ;;  %v3925_v13 = vld [vmem:[#allocation3 + $0x6a8] ss:$16 sps:$4 sm:$0xff]  }
  0xf7   :  { %2651 = vmatprep.subr.bf16.mxu0 %v3969_v15 }
  0xf9   :  { %2083 = vmatpush1.bf16.msra.mxu1 %v3874_v10  ;;  %v3918_v10 = vld [vmem:[#allocation3 + $0x64c] ss:$16 sps:$4 sm:$0xff]  }
  0xfa   :  { %2084 = vmatprep.subr.bf16.mxu1 %v3879_v52  ;;  %2652 = vmatpush1.bf16.msra.mxu0 %v3967_v19  ;;  %v3921_v52 = vld [vmem:[#allocation3 + $0x66c] ss:$16 sps:$4 sm:$0xff]  }
  0xfb   :  { %2653 = vmatprep.subr.bf16.mxu0 %v3972_v23  ;;  %v3931_v23 = vld [vmem:[#allocation3 + $0x6e8] ss:$16 sps:$4 sm:$0xff]  }
  0xfd   :  { %2085 = vmatpush1.bf16.msra.mxu1 %v3877_v12  ;;  %v3924_v12 = vld [vmem:[#allocation3 + $0x68c] ss:$16 sps:$4 sm:$0xff]  }
  0xfe   :  { %2086 = vmatprep.subr.bf16.mxu1 %v3882_v14  ;;  %2654 = vmatpush1.bf16.msra.mxu0 %v3970_v46  ;;  %v3934_v46 = vld [vmem:[#allocation3 + $0x708] ss:$16 sps:$4 sm:$0xff]  }
  0xff   :  { %2655 = vmatprep.subr.bf16.mxu0 %v3975_v25  ;;  %v4002_v25 = vld [vmem:[#allocation6 + $0xe4] ss:$8 sps:$4 sm:$0xff]  }
 0x101   :  { %2087 = vmatpush1.bf16.msra.mxu1 %v3880_v16  ;;  %v3928_v16 = vld [vmem:[#allocation3 + $0x6c8] ss:$16 sps:$4 sm:$0xff]  }
 0x102   :  { %2088 = vmatprep.subr.bf16.mxu1 %v3885_v20  ;;  %2656 = vmatpush1.bf16.msra.mxu0 %v3973_v27  ;;  %v3933_v20 = vld [vmem:[#allocation3 + $0x6ec] ss:$16 sps:$4 sm:$0xff]   ;;  %v4000_v27 = vld [vmem:[#allocation6 + $0xe0] ss:$8 sps:$4 sm:$0xff]  }
 0x103   :  { %2657 = vmatprep.subr.bf16.mxu0 %v3978_v29  ;;  %v4005_v29 = vld [vmem:[#allocation6 + $0xf4] ss:$8 sps:$4 sm:$0xff]  }
 0x105   :  { %2089 = vmatpush1.bf16.msra.mxu1 %v3883_v42  ;;  %v3936_v42 = vld [vmem:[#allocation3 + $0x70c] ss:$16 sps:$4 sm:$0xff]  }
 0x106   :  { %2090 = vmatprep.subr.bf16.mxu1 %v3888_v24  ;;  %2658 = vmatpush1.bf16.msra.mxu0 %v3976_v32  ;;  %v3939_v24 = vld [vmem:[#allocation3 + $0x72c] ss:$16 sps:$4 sm:$0xff]   ;;  %v4003_v32 = vld [vmem:[#allocation6 + $0xf0] ss:$8 sps:$4 sm:$0xff]  }
 0x107   :  { %2659 = vmatprep.subr.bf16.mxu0 %v3981_v36  ;;  %v3943_v36 = vld [vmem:[#allocation3 + $0x768] ss:$16 sps:$4 sm:$0xff]  }
 0x109   :  { %2091 = vmatpush1.bf16.msra.mxu1 %v3886_v26  ;;  %v3937_v26 = vld [vmem:[#allocation3 + $0x728] ss:$16 sps:$4 sm:$0xff]  }
 0x10a   :  { %2092 = vmatprep.subr.bf16.mxu1 %v3891_v30  ;;  %2660 = vmatpush1.bf16.msra.mxu0 %v3979_v38  ;;  %v3942_v30 = vld [vmem:[#allocation3 + $0x74c] ss:$16 sps:$4 sm:$0xff]  }
 0x10b   :  { %2661 = vmatprep.subr.bf16.mxu0 %v3984_v40  ;;  %v4008_v38 = vld [vmem:[#allocation6 + $0x104] ss:$8 sps:$4 sm:$0xff]  }
 0x10c   :  { %v3951_v40 = vld [vmem:[#allocation3 + $0x7ac] ss:$16 sps:$4 sm:$0xff]  }
 0x10d   :  { %2093 = vmatpush1.bf16.msra.mxu1 %v3889_v31  ;;  %v3940_v31 = vld [vmem:[#allocation3 + $0x748] ss:$16 sps:$4 sm:$0xff]  }
 0x10e   :  { %2094 = vmatprep.subr.bf16.mxu1 %v3894_v33  ;;  %2662 = vmatpush1.bf16.msra.mxu0 %v3982_v43  ;;  %v3945_v33 = vld [vmem:[#allocation3 + $0x76c] ss:$16 sps:$4 sm:$0xff]  }
 0x10f   :  { %2663 = vmatprep.subr.bf16.mxu0 %v3987_v45  ;;  %v3954_v43 = vld [vmem:[#allocation3 + $0x7cc] ss:$16 sps:$4 sm:$0xff]  }
 0x110   :  { %v3957_v45 = vld [vmem:[#allocation3 + $0x7ec] ss:$16 sps:$4 sm:$0xff]  }
 0x111   :  { %2095 = vmatpush1.bf16.msra.mxu1 %v3892_v37  ;;  %v3948_v37 = vld [vmem:[#allocation3 + $0x78c] ss:$16 sps:$4 sm:$0xff]  }
 0x112   :  { %2096 = vmatprep.subr.bf16.mxu1 %v3897_v39  ;;  %2664 = vmatpush1.bf16.msra.mxu0 %v3985_v48  ;;  %v3946_v39 = vld [vmem:[#allocation3 + $0x788] ss:$16 sps:$4 sm:$0xff]   ;;  %v4415_v48 = vshll.u32 %v4245_v1, 9 }
 0x113   :  { %2665 = vmatprep.subr.bf16.mxu0 %v3990_v50 }
 0x114   :  { %v2161_v50 = vor.u32 %v4415_v48, %v4247_v2 }
 0x115   :  { %2097 = vmatpush1.bf16.msra.mxu1 %v3895_v41  ;;  %v3949_v41 = vld [vmem:[#allocation3 + $0x7a8] ss:$16 sps:$4 sm:$0xff]  }
 0x116   :  { %2098 = vmatprep.subr.bf16.mxu1 %v3900_v44  ;;  %2666 = vmatpush1.bf16.msra.mxu0 %v3988_v54  ;;  %v3952_v44 = vld [vmem:[#allocation3 + $0x7c8] ss:$16 sps:$4 sm:$0xff]   ;;  %v2165_v54 = vxor.u32 %v2161_v50, %v4258_v5  ;;  %v4014_v50 = vld [vmem:[#allocation6 + $0x124] ss:$8 sps:$4 sm:$0xff]  }
 0x117   :  { %2667 = vmatprep.subr.bf16.mxu0 %v3993_v56 }
 0x118   :  { %v2169_v56 = vadd.s32 180150005, %v2165_v54  ;;  %v4017_v54 = vld [vmem:[#allocation6 + $0x134] ss:$8 sps:$4 sm:$0xff]  }
 0x119   :  { %2099 = vmatpush1.bf16.msra.mxu1 %v3898_v47  ;;  %v3955_v47 = vld [vmem:[#allocation3 + $0x7e8] ss:$16 sps:$4 sm:$0xff]  }
 0x11a   :  { %2100 = vmatprep.subr.bf16.mxu1 %v3903_v49  ;;  %2668 = vmatpush1.bf16.msra.mxu0 %v3991_v58  ;;  %v2162_v49 = vor.u32 %v4415_v48, %v4250_v3  ;;  %v2173_v58 = vadd.s32 2654435769, %v2169_v56  ;;  %v4020_v56 = vld [vmem:[#allocation6 + $0x144] ss:$8 sps:$4 sm:$0xff]  }
 0x11b   :  { %2669 = vmatprep.subr.bf16.mxu0 %v3996_v60 }
 0x11c   :  { %v2177_v0 = vshll.u32 %v2173_v58, 16 }
 0x11d   :  { %2101 = vmatpush1.bf16.msra.mxu1 %v3901_v53  ;;  %v2166_v53 = vxor.u32 %v2162_v49, %v4258_v5  ;;  %v4009_v49 = vld [vmem:[#allocation6 + $0x110] ss:$8 sps:$4 sm:$0xff]  }
 0x11e   :  { %2102 = vmatprep.subr.bf16.mxu1 %v3906_v55  ;;  %2670 = vmatpush1.bf16.msra.mxu0 %v3994_v17  ;;  %v2181_v60 = vxor.u32 %v2177_v0, %v2173_v58  ;;  %v4023_v58 = vld [vmem:[#allocation6 + $0x154] ss:$8 sps:$4 sm:$0xff]   ;;  %v4026_v0 = vld [vmem:[#allocation6 + $0x164] ss:$8 sps:$4 sm:$0xff]  }
 0x11f   :  { %2671 = vmatprep.subr.bf16.mxu0 %v3999_v63  ;;  %v2170_v55 = vadd.s32 180150005, %v2166_v53  ;;  %v4012_v53 = vld [vmem:[#allocation6 + $0x120] ss:$8 sps:$4 sm:$0xff]  }
 0x120   :  { %v2185_v17 = vadd.s32 2246822519, %v2181_v60  ;;  %v4029_v60 = vld [vmem:[#allocation6 + $0x174] ss:$8 sps:$4 sm:$0xff]  }
 0x121   :  { %2103 = vmatpush1.bf16.msra.mxu1 %v3904_v57  ;;  %v2174_v57 = vadd.s32 2654435769, %v2170_v55  ;;  %v4015_v55 = vld [vmem:[#allocation6 + $0x130] ss:$8 sps:$4 sm:$0xff]  }
 0x122   :  { %2104 = vmatprep.subr.bf16.mxu1 %v3909_v59  ;;  %2672 = vmatpush1.bf16.msra.mxu0 %v3997_v8  ;;  %v2189_v63 = vshll.u32 %v2185_v17, 8 }
 0x123   :  { %2673 = vmatprep.subr.bf16.mxu0 %v4002_v25  ;;  %v2178_v59 = vshll.u32 %v2174_v57, 16 }
 0x125   :  { %2105 = vmatpush1.bf16.msra.mxu1 %v3907_v51 }
 0x126   :  { %2115 = vmatprep.subr.bf16.mxu1 %v3912_v62  ;;  %2674 = vmatpush1.bf16.msra.mxu0 %v4000_v27 }
 0x127   :  { %2675 = vmatprep.subr.bf16.mxu0 %v4005_v29 }
 0x128   :  { %3406 = vmatmul.mubr.msk.bf16.vlgmr.msra.gmra.mrb[4].mxu1 %vm4365_vm11, %v4369_v22  ;;  %v3927_v22 = vld [vmem:[#allocation3 + $0x6ac] ss:$16 sps:$4 sm:$0xff]  }
 0x129   :  { %2116 = vmatpush1.bf16.msra.mxu1 %v3910_v7  ;;  %3409 = vmatprep.mubr.msk.bf16.mxu1 %vm4376_vm13, %v4371_v34 }
 0x12a   :  { %2117 = vmatprep.subr.bf16.mxu1 %v3915_v9  ;;  %2676 = vmatpush1.bf16.msra.mxu0 %v4003_v32  ;;  %v2193_v9 = vxor.u32 %v2189_v63, %v2185_v17  ;;  %v4032_v17 = vld [vmem:[#allocation6 + $0x184] ss:$8 sps:$4 sm:$0xff]   ;;  %v4035_v63 = vld [vmem:[#allocation6 + $0x194] ss:$8 sps:$4 sm:$0xff]  }
 0x12b   :  { %2686 = vmatprep.subr.bf16.mxu0 %v4008_v38 }
 0x12d   :  { %2118 = vmatpush1.bf16.msra.mxu1 %v3913_v61  ;;  %v2197_v61 = vadd.s32 2654435769, %v2193_v9  ;;  %v4038_v9 = vld [vmem:[#allocation6 + $0x1a4] ss:$8 sps:$4 sm:$0xff]  }
 0x12e   :  { %2119 = vmatprep.subr.bf16.mxu1 %v3918_v10 }
 0x131   :  { %2120 = vmatpush1.bf16.msra.mxu1 %v3916_v11  ;;  %v2201_v11 = vshll.u32 %v2197_v61, 4 }
 0x132   :  { %2121 = vmatprep.subr.bf16.mxu1 %v3921_v52 }
 0x135   :  { %2122 = vmatpush1.bf16.msra.mxu1 %v3919_v4  ;;  %v2205_v4 = vxor.u32 %v2201_v11, %v2197_v61  ;;  %v2164_v61 = vor.u32 %v4415_v48, %v4267_v18  ;;  %v2163_v11 = vor.u32 %v4415_v48, %v4273_v21  ;;  %v4045_v18 = vld [vmem:[#allocation6 + $0x1d0] ss:$8 sps:$4 sm:$0xff]   ;;  %v4048_v48 = vld [vmem:[#allocation6 + $0x1e0] ss:$8 sps:$4 sm:$0xff]  }
 0x136   :  { %2123 = vmatprep.subr.bf16.mxu1 %v3924_v12 }
 0x139   :  { %2124 = vmatpush1.bf16.msra.mxu1 %v3922_v28  ;;  %v2209_v28 = vadd.s32 2246822519, %v2205_v4  ;;  %v2168_v4 = vxor.u32 %v2164_v61, %v4258_v5 }
 0x13a   :  { %2125 = vmatprep.subr.bf16.mxu1 %v3927_v22 }
 0x13b   :  { %v4407_v34 = vpop.f32.mrb[0].mxu1 }
 0x13c   :  { %v4409_v14 = vpop.f32.mrb[1].mxu1 }
 0x13d   :  { %v1866_v15 = vpop.f32.mrb[2].mxu1  ;;  %2126 = vmatpush1.bf16.msra.mxu1 %v3925_v13  ;;  %v2213_v13 = vshll.u32 %v2209_v28, 2 }
 0x13e   :  { %v1867_v19 = vpop.f32.mrb[3].mxu1  ;;  %2127 = vmatprep.subr.bf16.mxu1 %v3930_v35 }
 0x13f   :  { %v2217_v15 = vxor.u32 %v2213_v13, %v2209_v28  ;;  %v4429_v19 = vld [vmem:[%s4557_s3] sm:$0xf]  ;;  %v2167_v28 = vxor.u32 %v2163_v11, %v4258_v5  ;;  %v2172_v13 = vadd.s32 180150005, %v2168_v4 }
 0x141   :  { %2128 = vmatpush1.bf16.msra.mxu1 %v3928_v16  ;;  %v4424_v16 = vsub.s32 0, %v4245_v1 }
 0x142   :  { %2129 = vmatprep.subr.bf16.mxu1 %v3933_v20  ;;  %v4432_v20 = vsub.s32 1, %v4245_v1 }
 0x145   :  { %2130 = vmatpush1.bf16.msra.mxu1 %v3931_v23 }
 0x146   :  { %2131 = vmatprep.subr.bf16.mxu1 %v3936_v42  ;;  %v2221_v42 = vadd.s32 2654435769, %v2217_v15  ;;  %v2171_v15 = vadd.s32 180150005, %v2167_v28  ;;  %v4056_v28 = vld [vmem:[%s4562_s8 + $0x48] sm:$0xff]  }
 0x148   :  { %v2175_v21 = vadd.s32 2654435769, %v2171_v15  ;;  %v4060_v15 = vld [vmem:[%s4562_s8 + $0x58] sm:$0xff]  }
 0x149   :  { %2132 = vmatpush1.bf16.msra.mxu1 %v3934_v46  ;;  %v531_v46 = vrot.slane %v4429_v19, %v4424_v16 }
 0x14a   :  { %2133 = vmatprep.subr.bf16.mxu1 %v3939_v24  ;;  %v535_v24 = vrot.slane %v4429_v19, %v4432_v20 }
 0x14b   :  { %v1863_v27 = vadd.f32 %v4407_v34, %v531_v46  ;;  %v4006_v34 = vld [vmem:[#allocation6 + $0x100] ss:$8 sps:$4 sm:$0xff]  }
 0x14d   :  { %2134 = vmatpush1.bf16.msra.mxu1 %v3937_v26  ;;  %v2225_v26 = vshll.u32 %v2221_v42, 1 }
 0x14e   :  { %2135 = vmatprep.subr.bf16.mxu1 %v3942_v30  ;;  %v1865_v30 = vadd.f32 %v4409_v14, %v535_v24  ;;  %v4011_v14 = vld [vmem:[#allocation6 + $0x114] ss:$8 sps:$4 sm:$0xff]  }
 0x14f   :  { %v4053_v24 = vld [vmem:[#allocation6 + $0x1f4] ss:$8 sps:$4 sm:$0xff]  }
 0x151   :  { %2136 = vmatpush1.bf16.msra.mxu1 %v3940_v31 }
 0x152   :  { %2137 = vmatprep.subr.bf16.mxu1 %v3945_v33 }
 0x155   :  { %2138 = vmatpush1.bf16.msra.mxu1 %v3943_v36  ;;  %v2229_v36 = vxor.u32 %v2225_v26, %v2221_v42  ;;  %v4050_v42 = vld [vmem:[#allocation6 + $0x1e4] ss:$8 sps:$4 sm:$0xff]   ;;  %v4051_v26 = vld [vmem:[#allocation6 + $0x1f0] ss:$8 sps:$4 sm:$0xff]  }
 0x156   :  { %2139 = vmatprep.subr.bf16.mxu1 %v3948_v37 }
 0x157   :  { %vm2233_vm1 = vcmp.ge.s32.totalorder %v2229_v36, 0 }
 0x158   :  { %vm3480_vm3 = vmpackc.low %vm2233_vm1, %vm2233_vm1 }
 0x159   :  { %2140 = vmatpush1.bf16.msra.mxu1 %v3946_v39 }
 0x15a   :  { %2141 = vmatprep.subr.bf16.mxu1 %v3951_v40 }
 0x15d   :  { %2142 = vmatpush1.bf16.msra.mxu1 %v3949_v41 }
 0x15e   :  { %2143 = vmatprep.subr.bf16.mxu1 %v3954_v43 }
 0x161   :  { %2144 = vmatpush1.bf16.msra.mxu1 %v3952_v44 }
 0x162   :  { %2145 = vmatprep.subr.bf16.mxu1 %v3957_v45 }
 0x165   :  { %2146 = vmatpush1.bf16.msra.mxu1 %v3955_v47 }
 0x168   :  { %3412 = vmatmul.mubr.msk.bf16.vlgmr.msra.gmra.mrb[4].mxu1 %vm4392_vm15, %v4396_v6  ;;  %v2182_v6 = vxor.u32 %v2178_v59, %v2174_v57  ;;  %v4018_v57 = vld [vmem:[#allocation6 + $0x140] ss:$8 sps:$4 sm:$0xff]   ;;  %v4021_v59 = vld [vmem:[#allocation6 + $0x150] ss:$8 sps:$4 sm:$0xff]  }
 0x16a   :  { %v2186_v51 = vadd.s32 2246822519, %v2182_v6  ;;  %v4024_v6 = vld [vmem:[#allocation6 + $0x160] ss:$8 sps:$4 sm:$0xff]  }
 0x16c   :  { %v2190_v62 = vshll.u32 %v2186_v51, 8 }
 0x16e   :  { %v2194_v7 = vxor.u32 %v2190_v62, %v2186_v51  ;;  %v4027_v51 = vld [vmem:[#allocation6 + $0x170] ss:$8 sps:$4 sm:$0xff]   ;;  %v4030_v62 = vld [vmem:[#allocation6 + $0x180] ss:$8 sps:$4 sm:$0xff]  }
 0x170   :  { %v2198_v8 = vadd.s32 2654435769, %v2194_v7  ;;  %v4033_v7 = vld [vmem:[#allocation6 + $0x190] ss:$8 sps:$4 sm:$0xff]  }
 0x172   :  { %v2202_v10 = vshll.u32 %v2198_v8, 4 }
 0x174   :  { %v2206_v52 = vxor.u32 %v2202_v10, %v2198_v8  ;;  %v4036_v8 = vld [vmem:[#allocation6 + $0x1a0] ss:$8 sps:$4 sm:$0xff]   ;;  %v4041_v10 = vld [vmem:[#allocation6 + $0x1b4] ss:$8 sps:$4 sm:$0xff]  }
 0x176   :  { %v2210_v12 = vadd.s32 2246822519, %v2206_v52  ;;  %v4039_v52 = vld [vmem:[#allocation6 + $0x1b0] ss:$8 sps:$4 sm:$0xff]  }
 0x178   :  { %v2214_v22 = vshll.u32 %v2210_v12, 2 }
 0x17a   :  { %v2218_v35 = vxor.u32 %v2214_v22, %v2210_v12  ;;  %v4044_v12 = vld [vmem:[#allocation6 + $0x1c4] ss:$8 sps:$4 sm:$0xff]   ;;  %v4042_v22 = vld [vmem:[#allocation6 + $0x1c0] ss:$8 sps:$4 sm:$0xff]  }
 0x17c   :  { %v2222_v23 = vadd.s32 2654435769, %v2218_v35  ;;  %v4047_v35 = vld [vmem:[#allocation6 + $0x1d4] ss:$8 sps:$4 sm:$0xff]  }
 0x17e   :  { %v2226_v25 = vshll.u32 %v2222_v23, 1 }
 0x180   :  { %v2230_v31 = vxor.u32 %v2226_v25, %v2222_v23  ;;  %v2176_v23 = vadd.s32 2654435769, %v2172_v13  ;;  %v2179_v25 = vshll.u32 %v2175_v21, 16  ;;  %v4058_v13 = vld [vmem:[%s4562_s8 + $0x50] sm:$0xff]  }
 0x182   :  { %vm2234_vm0 = vcmp.ge.s32.totalorder %v2230_v31, 0  ;;  %v2180_v46 = vshll.u32 %v2176_v23, 16 }
 0x183   :  { %vm3477_vm2 = vmpackc.low %vm2234_vm0, %vm2234_vm0 }
 0x1c0   :  { %v1985_v29 = vpop.f32.mrb[0].mxu0 }
 0x1c1   :  { %v3535_v32 = vadd.f32 %v1985_v29, %v1863_v27  ;;  %v1987_v33 = vpop.f32.mrb[1].mxu0  ;;  %v2184_v27 = vxor.u32 %v2180_v46, %v2176_v23  ;;  %v4062_v23 = vld [vmem:[%s4562_s8 + $0x60] sm:$0xff]   ;;  %v4066_v46 = vld [vmem:[%s4562_s8 + $0x70] sm:$0xff]  }
 0x1c2   :  { %v3537_v37 = vadd.f32 %v1987_v33, %v1865_v30  ;;  %v1989_v38 = vpop.f32.mrb[2].mxu0  ;;  %v2183_v30 = vxor.u32 %v2179_v25, %v2175_v21  ;;  %v4064_v21 = vld [vmem:[%s4562_s8 + $0x68] sm:$0xff]   ;;  %v4068_v25 = vld [vmem:[%s4562_s8 + $0x78] sm:$0xff]  }
 0x1c3   :  { %v2156_v39 = vmax.f32 %v3535_v32, 0.0  ;;  %v1990_v40 = vpop.f32.mrb[3].mxu0  ;;  %v2188_v29 = vadd.s32 2246822519, %v2184_v27  ;;  %v2313_v27 = vld [vmem:[%s4559_s5] sm:$0x3] }
 0x1c4   :  { %v2157_v41 = vmax.f32 %v3537_v37, 0.0  ;;  %v2187_v31 = vadd.s32 2246822519, %v2183_v30  ;;  %v2318_v30 = vrot.slane %v2313_v27, %v4424_v16 }
 0x1c5   :  { %v2237_v43 = vmul.f32 2.0, %v2156_v39  ;;  %v2192_v32 = vshll.u32 %v2188_v29, 8 }
 0x1c6   :  { %v2238_v44 = vmul.f32 2.0, %v2157_v41  ;;  %v2191_v33 = vshll.u32 %v2187_v31, 8 }
 0x1c7   :  { %v3481_v47 = vpack.c.bf16 %v2237_v43, %v2237_v43  ;;  %v2196_v36 = vxor.u32 %v2192_v32, %v2188_v29  ;;  %v2834_v29 = vshll.u32 %v4245_v1, 8 }
 0x1c8   :  { %v3478_v45 = vpack.c.bf16 %v2238_v44, %v2238_v44  ;;  %v2195_v37 = vxor.u32 %v2191_v33, %v2187_v31  ;;  %v2322_v31 = vrot.slane %v2313_v27, %v4432_v20 }
 0x1c9   :  { %v2200_v38 = vadd.s32 2654435769, %v2196_v36 }
 0x1ca   :  { %3479 = vmatprep.mubr.msk.bf16.mxu0 %vm3477_vm2, %v3478_v45  ;;  %v2199_v39 = vadd.s32 2654435769, %v2195_v37  ;;  %v2836_v37 = vor.u32 %v2834_v29, %v4250_v3 }
 0x1cb   :  { %3482 = vmatmul.mubr.msk.bf16.vlgmr.msra.gmra.mrb[4].mxu0 %vm3480_vm3, %v3481_v47  ;;  %v2204_v40 = vshll.u32 %v2200_v38, 4 }
 0x1cc   :  { %2687 = vmatpush1.bf16.msra.mxu0 %v4006_v34  ;;  %v2203_v41 = vshll.u32 %v2199_v39, 4 }
 0x1cd   :  { %2688 = vmatprep.subr.bf16.mxu0 %v4011_v14  ;;  %v2208_v43 = vxor.u32 %v2204_v40, %v2200_v38  ;;  %v2835_v40 = vor.u32 %v2834_v29, %v4247_v2 }
 0x1ce   :  { %v2207_v44 = vxor.u32 %v2203_v41, %v2199_v39 }
 0x1cf   :  { %v2212_v45 = vadd.s32 2246822519, %v2208_v43 }
 0x1d0   :  { %2689 = vmatpush1.bf16.msra.mxu0 %v4009_v49  ;;  %v2211_v34 = vadd.s32 2246822519, %v2207_v44 }
 0x1d1   :  { %2690 = vmatprep.subr.bf16.mxu0 %v4014_v50  ;;  %v2216_v47 = vshll.u32 %v2212_v45, 2 }
 0x1d2   :  { %v2215_v14 = vshll.u32 %v2211_v34, 2 }
 0x1d3   :  { %v2220_v49 = vxor.u32 %v2216_v47, %v2212_v45 }
 0x1d4   :  { %2691 = vmatpush1.bf16.msra.mxu0 %v4012_v53  ;;  %v2219_v50 = vxor.u32 %v2215_v14, %v2211_v34  ;;  %v2838_v34 = vxor.u32 %v2836_v37, %v4258_v5  ;;  %v2837_v14 = vxor.u32 %v2835_v40, %v4258_v5 }
 0x1d5   :  { %2692 = vmatprep.subr.bf16.mxu0 %v4017_v54  ;;  %v2224_v53 = vadd.s32 2654435769, %v2220_v49  ;;  %v538_v54 = vsub.s32 2, %v4245_v1 }
 0x1d8   :  { %2693 = vmatpush1.bf16.msra.mxu0 %v4015_v55  ;;  %v2223_v55 = vadd.s32 2654435769, %v2219_v50 }
 0x1d9   :  { %2694 = vmatprep.subr.bf16.mxu0 %v4020_v56  ;;  %v542_v56 = vsub.s32 3, %v4245_v1 }
 0x1dc   :  { %2695 = vmatpush1.bf16.msra.mxu0 %v4018_v57  ;;  %v2228_v57 = vshll.u32 %v2224_v53, 1 }
 0x1dd   :  { %2696 = vmatprep.subr.bf16.mxu0 %v4023_v58  ;;  %v539_v58 = vrot.slane %v4429_v19, %v538_v54 }
 0x1e0   :  { %2697 = vmatpush1.bf16.msra.mxu0 %v4021_v59  ;;  %v2227_v59 = vshll.u32 %v2223_v55, 1 }
 0x1e1   :  { %2698 = vmatprep.subr.bf16.mxu0 %v4026_v0  ;;  %v543_v0 = vrot.slane %v4429_v19, %v542_v56  ;;  %v4054_v19 = vld [vmem:[%s4562_s8 + $0x40] sm:$0xff]  }
 0x1e2   :  { %3512 = vmatprep.subr.bf16.mxu1 %v4054_v19 }
 0x1e4   :  { %2699 = vmatpush1.bf16.msra.mxu0 %v4024_v6 }
 0x1e5   :  { %2700 = vmatprep.subr.bf16.mxu0 %v4029_v60  ;;  %v2232_v60 = vxor.u32 %v2228_v57, %v2224_v53  ;;  %v2840_v53 = vadd.s32 133474243, %v2838_v34 }
 0x1e7   :  { %vm2236_vm4 = vcmp.ge.s32.totalorder %v2232_v60, 0 }
 0x1e8   :  { %2701 = vmatpush1.bf16.msra.mxu0 %v4027_v51  ;;  %vm3483_vm6 = vmpackc.low %vm2236_vm4, %vm2236_vm4 }
 0x1e9   :  { %2702 = vmatprep.subr.bf16.mxu0 %v4032_v17 }
 0x1ec   :  { %2703 = vmatpush1.bf16.msra.mxu0 %v4030_v62  ;;  %v2231_v62 = vxor.u32 %v2227_v59, %v2223_v55  ;;  %v2839_v55 = vadd.s32 133474243, %v2837_v14 }
 0x1ed   :  { %2704 = vmatprep.subr.bf16.mxu0 %v4035_v63 }
 0x1ee   :  { %vm2235_vm5 = vcmp.ge.s32.totalorder %v2231_v62, 0 }
 0x1ef   :  { %vm3486_vm7 = vmpackc.low %vm2235_vm5, %vm2235_vm5 }
 0x1f0   :  { %2705 = vmatpush1.bf16.msra.mxu0 %v4033_v7 }
 0x1f1   :  { %2706 = vmatprep.subr.bf16.mxu0 %v4038_v9 }
 0x1f4   :  { %2707 = vmatpush1.bf16.msra.mxu0 %v4036_v8 }
 0x1f5   :  { %2708 = vmatprep.subr.bf16.mxu0 %v4041_v10 }
 0x1f8   :  { %2709 = vmatpush1.bf16.msra.mxu0 %v4039_v52 }
 0x1f9   :  { %2710 = vmatprep.subr.bf16.mxu0 %v4044_v12  ;;  %v4055_v12 = vld [vmem:[%s4562_s8] sm:$0xff]  }
 0x1fa   :  { %3513 = vmatpush3.bf16.msra.mxu1 %v4055_v12 }
 0x1fb   :  { %3514 = vmatprep.subr.bf16.mxu1 %v4056_v28 }
 0x1fc   :  { %2711 = vmatpush1.bf16.msra.mxu0 %v4042_v22  ;;  %v4057_v22 = vld [vmem:[%s4562_s8 + $0x8] sm:$0xff]  }
 0x1fd   :  { %2712 = vmatprep.subr.bf16.mxu0 %v4047_v35  ;;  %v4059_v35 = vld [vmem:[%s4562_s8 + $0x10] sm:$0xff]  }
 0x1fe   :  { %3515 = vmatpush3.bf16.msra.mxu1 %v4057_v22 }
 0x1ff   :  { %3516 = vmatprep.subr.bf16.mxu1 %v4058_v13 }
 0x200   :  { %2713 = vmatpush1.bf16.msra.mxu0 %v4045_v18  ;;  %v4061_v18 = vld [vmem:[%s4562_s8 + $0x18] sm:$0xff]  }
 0x201   :  { %2714 = vmatprep.subr.bf16.mxu0 %v4050_v42  ;;  %v4063_v42 = vld [vmem:[%s4562_s8 + $0x20] sm:$0xff]  }
 0x202   :  { %3517 = vmatpush3.bf16.msra.mxu1 %v4059_v35 }
 0x203   :  { %3518 = vmatprep.subr.bf16.mxu1 %v4060_v15 }
 0x204   :  { %2715 = vmatpush1.bf16.msra.mxu0 %v4048_v48  ;;  %v4065_v48 = vld [vmem:[%s4562_s8 + $0x28] sm:$0xff]  }
 0x205   :  { %2716 = vmatprep.subr.bf16.mxu0 %v4053_v24  ;;  %v4067_v24 = vld [vmem:[%s4562_s8 + $0x30] sm:$0xff]  }
 0x206   :  { %3519 = vmatpush3.bf16.msra.mxu1 %v4061_v18 }
 0x207   :  { %3520 = vmatprep.subr.bf16.mxu1 %v4062_v23 }
 0x208   :  { %2717 = vmatpush1.bf16.msra.mxu0 %v4051_v26  ;;  %v4069_v26 = vld [vmem:[%s4562_s8 + $0x38] sm:$0xff]  }
 0x20a   :  { %3521 = vmatpush3.bf16.msra.mxu1 %v4063_v42 }
 0x20b   :  { %3522 = vmatprep.subr.bf16.mxu1 %v4064_v21 }
 0x20e   :  { %3523 = vmatpush3.bf16.msra.mxu1 %v4065_v48 }
 0x20f   :  { %3524 = vmatprep.subr.bf16.mxu1 %v4066_v46 }
 0x212   :  { %3525 = vmatpush3.bf16.msra.mxu1 %v4067_v24 }
 0x213   :  { %3526 = vmatprep.subr.bf16.mxu1 %v4068_v25 }
 0x216   :  { %3527 = vmatpush3.bf16.msra.mxu1 %v4069_v26 }
 0x23b   :  { %v2149_v6 = vpop.f32.mrb[4].mxu1 }
 0x23c   :  { %v3538_v51 = vadd.f32 %v2149_v6, %v539_v58  ;;  %v2151_v17 = vpop.f32.mrb[5].mxu1  ;;  %v2842_v58 = vadd.s32 2654435769, %v2840_v53 }
 0x23d   :  { %v3539_v63 = vadd.f32 %v2151_v17, %v543_v0  ;;  %v2153_v7 = vpop.f32.mrb[6].mxu1  ;;  %v2841_v0 = vadd.s32 2654435769, %v2839_v55 }
 0x23e   :  { %v2158_v9 = vmax.f32 %v3538_v51, 0.0  ;;  %v2154_v8 = vpop.f32.mrb[7].mxu1  ;;  %v2844_v17 = vshll.u32 %v2842_v58, 16 }
 0x23f   :  { %v2159_v61 = vmax.f32 %v3539_v63, 0.0  ;;  %v2843_v5 = vshll.u32 %v2841_v0, 16 }
 0x240   :  { %v2239_v10 = vmul.f32 2.0, %v2158_v9  ;;  %v2846_v8 = vxor.u32 %v2844_v17, %v2842_v58 }
 0x241   :  { %v2240_v11 = vmul.f32 2.0, %v2159_v61 }
 0x242   :  { %v3487_v4 = vpack.c.bf16 %v2239_v10, %v2239_v10  ;;  %v2845_v10 = vxor.u32 %v2843_v5, %v2841_v0  ;;  %v2848_v19 = vadd.s32 2246822519, %v2846_v8 }
 0x243   :  { %v3484_v52 = vpack.c.bf16 %v2240_v11, %v2240_v11 }
 0x244   :  { %v2847_v28 = vadd.s32 2246822519, %v2845_v10  ;;  %v2850_v15 = vshll.u32 %v2848_v19, 8 }
 0x245   :  { %3485 = vmatprep.mubr.msk.bf16.mxu0 %vm3483_vm6, %v3484_v52 }
 0x246   :  { %3488 = vmatmul.mubr.msk.bf16.vlgmr.msra.gmra.mrb[4].mxu0 %vm3486_vm7, %v3487_v4  ;;  %v2849_v23 = vshll.u32 %v2847_v28, 8  ;;  %v2852_v46 = vxor.u32 %v2850_v15, %v2848_v19 }
 0x248   :  { %v2851_v25 = vxor.u32 %v2849_v23, %v2847_v28 }
 0x24a   :  { %v2853_v29 = vadd.s32 2654435769, %v2851_v25 }
 0x24c   :  { %v2855_v37 = vshll.u32 %v2853_v29, 4 }
 0x319   :  { %v2720_v32 = vpop.f32.mrb[4].mxu0 }
 0x31a   :  { %v4504_v33 = vadd.f32 %v2720_v32, %v2318_v30  ;;  %v2722_v36 = vpop.f32.mrb[5].mxu0  ;;  %v2854_v30 = vadd.s32 2654435769, %v2852_v46 }
 0x31b   :  { %v4507_v38 = vadd.f32 %v2722_v36, %v2322_v31  ;;  %v2724_v39 = vpop.f32.mrb[6].mxu0  ;;  %v4154_v31 = vmov 1966171168  }
 0x31c   :  { %v2729_v41 = vrot.slane %v4504_v33, 4  ;;  %v2725_v43 = vpop.f32.mrb[7].mxu0  ;;  %v2770_v32 = vunpack.c.l.s4 %v4154_v31  ;;  %v2856_v36 = vshll.u32 %v2854_v30, 4 }
 0x31d   :  { %v2735_v44 = vrot.slane %v4507_v38, 4 }
 0x31e   :  { %v2730_v45 = vadd.f32 %v4504_v33, %v2729_v41  ;;  %v2771_v39 = vunpack.c.0.s8 %v2770_v32  ;;  %v2858_v40 = vxor.u32 %v2856_v36, %v2854_v30  ;;  %v2857_v41 = vxor.u32 %v2855_v37, %v2853_v29 }
 0x31f   :  { %v2736_v47 = vadd.f32 %v4507_v38, %v2735_v44 }
 0x320   :  { %v2731_v49 = vrot.slane %v2730_v45, 2  ;;  %v2774_v44 = vsub.s32 %v2771_v39, %v4245_v1  ;;  %v2859_v14 = vadd.s32 2246822519, %v2857_v41 }
 0x321   :  { %v2737_v3 = vrot.slane %v2736_v47, 2 }
 0x322   :  { %v2732_v50 = vadd.f32 %v2731_v49, %v2730_v45 }
 0x323   :  { %v2738_v54 = vadd.f32 %v2737_v3, %v2736_v47  ;;  %v2860_v47 = vadd.s32 2246822519, %v2858_v40  ;;  %v2727_v3 = vld [vmem:[%s4560_s6] sm:$0x3] }
 0x324   :  { %v2733_v2 = vrot.slane %v2732_v50, 1 }
 0x325   :  { %v2739_v56 = vrot.slane %v2738_v54, 1  ;;  %v2862_v53 = vshll.u32 %v2860_v47, 2 }
 0x326   :  { %v2734_v57 = vadd.f32 %v2733_v2, %v2732_v50 }
 0x327   :  { %v2740_v59 = vadd.f32 %v2739_v56, %v2738_v54  ;;  %v2861_v54 = vshll.u32 %v2859_v14, 2 }
 0x328   :  { %v2742_v6 = vmul.f32 0.125, %v2734_v57  ;;  %v2864_v57 = vxor.u32 %v2862_v53, %v2860_v47 }
 0x329   :  { %v2743_v60 = vmul.f32 0.125, %v2740_v59  ;;  %v2863_v58 = vxor.u32 %v2861_v54, %v2859_v14  ;;  %v3055_v14 = vld [vmem:[%s4565_s11] sm:$0x1] }
 0x32a   :  { %v2744_v51 = vsub.f32 %v4504_v33, %v2742_v6 }
 0x32b   :  { %v2745_v62 = vsub.f32 %v4507_v38, %v2743_v60  ;;  %v2865_v5 = vadd.s32 2654435769, %v2863_v58 }
 0x32c   :  { %v2746_v63 = vmul.f32 %v2744_v51, %v2744_v51 }
 0x32d   :  { %v2747_v7 = vmul.f32 %v2745_v62, %v2745_v62  ;;  %v2866_v62 = vadd.s32 2654435769, %v2864_v57 }
 0x32e   :  { %v2748_v9 = vrot.slane %v2746_v63, 4 }
 0x32f   :  { %v2754_v61 = vrot.slane %v2747_v7, 4  ;;  %v2868_v8 = vshll.u32 %v2866_v62, 1 }
 0x330   :  { %v2749_v11 = vadd.f32 %v2748_v9, %v2746_v63 }
 0x331   :  { %v2755_v52 = vadd.f32 %v2754_v61, %v2747_v7  ;;  %v2728_v7 = vld [vmem:[%s4561_s7] sm:$0x3]  ;;  %v2867_v61 = vshll.u32 %v2865_v5, 1 }
 0x332   :  { %v2750_v4 = vrot.slane %v2749_v11, 2 }
 0x333   :  { %v2756_v12 = vrot.slane %v2755_v52, 2 }
 0x334   :  { %v2751_v22 = vadd.f32 %v2750_v4, %v2749_v11 }
 0x335   :  { %v2757_v13 = vadd.f32 %v2756_v12, %v2755_v52 }
 0x336   :  { %v2752_v35 = vrot.slane %v2751_v22, 1 }
 0x337   :  { %v2758_v18 = vrot.slane %v2757_v13, 1 }
 0x338   :  { %v2753_v42 = vadd.f32 %v2752_v35, %v2751_v22 }
 0x339   :  { %v2759_v21 = vadd.f32 %v2758_v18, %v2757_v13 }
 0x33a   :  { %v2760_v48 = vmul.f32 0.125, %v2753_v42 }
 0x33b   :  { %v2761_v24 = vmul.f32 0.125, %v2759_v21 }
 0x33c   :  { %v2762_v26 = vadd.f32 1e-05, %v2760_v48 }
 0x33d   :  { %v2763_v27 = vadd.f32 1e-05, %v2761_v24 }
 0x33e   :  { %4070 = vrsqrt.f32 %v2762_v26 }
 0x33f   :  { %4072 = vrsqrt.f32 %v2763_v27 }
 0x348   :  { %v4071_v43 = vpop.eup %4070 }
 0x349   :  { %v4073_v45 = vpop.eup %4072 }
 0x34a   :  { %v2768_v34 = vcombine.low %v4071_v43, %v4073_v45  ;;  %v3054_v45 = vld [vmem:[%s4564_s10] sm:$0x1]  ;;  %s4120_s10 = scalar_lea.vmem %s3100_s25, 128 }
 0x34b   :  { %p4121_p2 = scmp.ne.s32.totalorder %s3100_s25, %s4120_s10  ;;  %p4126_p4 = scmp.lt.s32.totalorder %s4120_s10, %s4120_s10 }
 0x34c   :  { %v2775_v49 = vrot.slane %v2768_v34, %v2774_v44 }
 0x34d   :  { %p4127_p5 = por %p4126_p4, %p4125_p3 }
 0x34e   :  { %v2782_v50 = vrot.slane %v2775_v49, %v2774_v44 }
 0x34f   :  { %p4128_p6 = pnand %p4127_p5, %p4121_p2 }
 0x350   :  { %v2784_v55 = vmul.f32 %v2782_v50, %v2727_v3 }
 0x352   :  { %v2789_v2 = vrot.slane %v2784_v55, %v4424_v16  ;;  %v2793_v56 = vrot.slane %v2784_v55, %v4432_v20 }
 0x354   :  { %v2797_v1 = vmul.f32 %v4507_v38, %v2793_v56  ;;  %v2798_v59 = vmul.f32 %v2789_v2, %v2742_v6  ;;  %v2799_v0 = vmul.f32 %v2793_v56, %v2743_v60  ;;  %v2796_v51 = vmul.f32 %v4504_v33, %v2789_v2 }
 0x355   :  { %v2870_v6 = vxor.u32 %v2868_v8, %v2866_v62  ;;  %v2869_v60 = vxor.u32 %v2867_v61, %v2865_v5 }
 0x356   :  { %v2802_v17 = vcombine.low %v2798_v59, %v2799_v0 }
 0x357   :  { %vm2872_vm8 = vcmp.ge.s32.totalorder %v2870_v6, 0  ;;  %vm2871_vm9 = vcmp.ge.s32.totalorder %v2869_v60, 0 }
 0x358   :  { %v2809_v63 = vrot.slane %v2802_v17, %v2774_v44  ;;  %vm3506_vm10 = vmpackc.low %vm2872_vm8, %vm2872_vm8 }
 0x359   :  { %vm3509_vm11 = vmpackc.low %vm2871_vm9, %vm2871_vm9 }
 0x35a   :  { %v2816_v9 = vrot.slane %v2809_v63, %v2774_v44 }
 0x35c   :  { %v2818_v10 = vsub.f32 %v2728_v7, %v2816_v9 }
 0x35e   :  { %v2823_v11 = vrot.slane %v2818_v10, %v4424_v16  ;;  %v2827_v38 = vrot.slane %v2818_v10, %v4432_v20  ;;  %v3489_v20 = vld [vmem:[%s4563_s9] ss:$0 sm:$0xff] }
 0x360   :  { %v2831_v52 = vadd.f32 %v2827_v38, %v2797_v1  ;;  %v2830_v33 = vadd.f32 %v2823_v11, %v2796_v51 }
 0x362   :  { %v2833_v4 = vmax.f32 %v2831_v52, 0.0  ;;  %v2832_v19 = vmax.f32 %v2830_v33, 0.0 }
 0x364   :  { %v2874_v12 = vmul.f32 2.0, %v2833_v4  ;;  %v2873_v28 = vmul.f32 2.0, %v2832_v19 }
 0x366   :  { %v3507_v22 = vpack.c.bf16 %v2874_v12, %v2874_v12  ;;  %v3510_v13 = vpack.c.bf16 %v2873_v28, %v2873_v28 }
 0x368   :  { %3508 = vmatprep.mubr.msk.bf16.mxu1 %vm3506_vm10, %v3507_v22 }
 0x369   :  { %3511 = vmatmul.mubr.msk.bf16.vlgmr.msra.gmra.mrb[8].mxu1 %vm3509_vm11, %v3510_v13 }
 0x43c   :  { %v3528_v35 = vpop.f32.mrb[8].mxu1 }
 0x43d   :  { %v3529_v15 = vpop.f32.mrb[9].mxu1 }
 0x43e   :  { %v3530_v18 = vadd.f32 %v3529_v15, %v3528_v35  ;;  %v3531_v23 = vpop.f32.mrb[10].mxu1 }
 0x43f   :  { %v3532_v42 = vpop.f32.mrb[11].mxu1 }
 0x440   :  { %v3049_v21 = vadd.f32 %v3530_v18, %v3489_v20 }
 0x442   :  { %v3056_v48 = vrot.slane %v3049_v21, 4 }
 0x444   :  { %v3057_v46 = vadd.f32 %v3056_v48, %v3049_v21 }
 0x446   :  { %v3058_v24 = vrot.slane %v3057_v46, 2 }
 0x448   :  { %v3059_v25 = vadd.f32 %v3058_v24, %v3057_v46 }
 0x44a   :  { %v3060_v26 = vrot.slane %v3059_v25, 1 }
 0x44c   :  { %v3061_v27 = vadd.f32 %v3060_v26, %v3059_v25 }
 0x44e   :  { %v3062_v30 = vmul.f32 0.125, %v3061_v27 }
 0x450   :  { %v3063_v29 = vsub.f32 %v3049_v21, %v3062_v30 }
 0x452   :  { %v3064_v31 = vmul.f32 %v3063_v29, %v3063_v29 }
 0x454   :  { %v3065_v32 = vrot.slane %v3064_v31, 4 }
 0x456   :  { %v3066_v36 = vadd.f32 %v3065_v32, %v3064_v31 }
 0x458   :  { %v3067_v37 = vrot.slane %v3066_v36, 2 }
 0x45a   :  { %v3068_v39 = vadd.f32 %v3067_v37, %v3066_v36 }
 0x45c   :  { %v3069_v40 = vrot.slane %v3068_v39, 1 }
 0x45e   :  { %v3070_v41 = vadd.f32 %v3069_v40, %v3068_v39 }
 0x460   :  { %v3071_v43 = vmul.f32 0.125, %v3070_v41 }
 0x462   :  { %v3072_v44 = vadd.f32 1e-05, %v3071_v43 }
 0x464   :  { %4074 = vrsqrt.f32 %v3072_v44 }
 0x46e   :  { %v4075_v34 = vpop.eup %4074 }
 0x46f   :  { %v3074_v47 = vmul.f32 %v4075_v34, %v3054_v45 }
 0x471   :  { %v3079_v49 = vrot.slane %v3074_v47, %v4424_v16  ;;  %v3082_v3 = vmul.f32 %v3074_v47, %v3062_v30 }
 0x473   :  { %v3083_v50 = vsub.f32 %v3055_v14, %v3082_v3  ;;  %v3081_v53 = vmul.f32 %v3079_v49, %v3049_v21 }
 0x475   :  { %v3088_v54 = vrot.slane %v3083_v50, %v4424_v16 }
 0x477   :  { %v3090_v55 = vadd.f32 %v3088_v54, %v3081_v53 }
 0x479   :  { %v3091_v2 = vmax.f32 %v3090_v55, 0.0 }
 0x47b   :  { %3092 = vst [vmem:[#allocation8] sm:$0xff] %v3091_v2 }
 0x47c   :  { %4131 = shalt.err (!%p4128_p6)
}
 0x47d   :  { %s4132_s27 = scalar_lea.hbm %s4566_s12, 128 }
 0x47e   :  { %p4133_p7 = scmp.ne.s32.totalorder %s4566_s12, %s4132_s27  ;;  %p4136_p8 = scmp.lt.u32.totalorder %s4132_s27, %s4566_s12 }
 0x480   :  { %p4138_p9 = pnand %p4136_p8, %p4133_p7 }
 0x482   :  { %4141 = shalt.err (!%p4138_p9)
}
 0x483   :  { %3102 = dma.vmem_to_hbm [thread:$0]  %s3100_s25, 128, %s4566_s12, [#allocation5]  }
 0x484   :  { %4146 = dma.done.wait [#allocation5], 128  }
 0x485   :  { %4147 = vsyncadd [#allocation5], 4294967168 }
 0x486   :  { %3106 = vsyncpa [#allocation4], 1 }
 0x487   :  { %3107 = vsyncpa [#allocation7], 1 }
 0x488   :  { %3108 = vsyncpa [#allocation5], 1 }

</bundles_post_ra>
